<compile_context>
chip_gen: v7x
topology: tpu7x:2x2x1
jax: 0.10.0
libtpu: 0.0.40
codegen_flags: <defaults>
</compile_context>

<pallas_src>
import numpy as np
import jax
import jax.numpy as jnp
from jax.experimental import pallas as pl
from jax.experimental.pallas import tpu as pltpu


def _round_up(x, m):
    return ((x + m - 1) // m) * m


def conv3d_batchnorm_forward(x, weight, bias, gamma, beta, *,
                             stride=1, padding=1, dilation=1,
                             eps=1e-5, is_batchnorm=True):
    """Forward of conv3DBatchNorm: BatchNorm3d(Conv3d(x)) (training-mode BN).

    x      : (N, Cin, D, H, W) float32
    weight : (Cout, Cin, KD, KH, KW) float32
    bias   : (Cout,) or None
    gamma, beta : (Cout,) BatchNorm affine parameters
    """
    N, Cin, D, H, W = x.shape
    Cout, _, KD, KH, KW = weight.shape
    st = (stride,) * 3 if isinstance(stride, int) else tuple(stride)
    pd = (padding,) * 3 if isinstance(padding, int) else tuple(padding)
    dl = (dilation,) * 3 if isinstance(dilation, int) else tuple(dilation)

    Dp, Hp, Wp = D + 2 * pd[0], H + 2 * pd[1], W + 2 * pd[2]
    Do = (Dp - dl[0] * (KD - 1) - 1) // st[0] + 1
    Ho = (Hp - dl[1] * (KH - 1) - 1) // st[1] + 1
    Wo = (Wp - dl[2] * (KW - 1) - 1) // st[2] + 1

    KHW = KH * KW
    HWp = Hp * Wp
    # flattened (within a padded depth plane) lane offsets of the KH*KW taps
    offs = [kh * dl[1] * Wp + kw * dl[2] for kh in range(KH) for kw in range(KW)]
    max_off = max(offs)
    # last valid flattened output base position + 1, padded to a lane multiple
    M_eff = (Ho - 1) * st[1] * Wp + (Wo - 1) * st[2] + 1
    M_pad = _round_up(M_eff, 128)
    # plane length so every static window slice [off : off + M_pad] is in bounds
    HWp_arr = max(HWp, M_pad + max_off)
    Cin_p = _round_up(Cin, 8)              # pad contraction dim to a full sublane group

    # ---------------- host prep: one cheap pass over the input -----------------
    xp = jnp.pad(x, ((0, 0), (0, 0),
                     (pd[0], pd[0]), (pd[1], pd[1]), (pd[2], pd[2])))
    # (N, Cin, Dp, Hp, Wp) -> (N, Dp, Cin_p, HWp_arr) bf16 depth planes
    xp = jnp.transpose(xp, (0, 2, 1, 3, 4)).reshape(N, Dp, Cin, HWp)
    xp = jnp.pad(xp, ((0, 0), (0, 0), (0, Cin_p - Cin), (0, HWp_arr - HWp)))
    xp = xp.astype(jnp.bfloat16)

    # weights -> (KD*KH*KW, Cout, Cin_p) bf16, fully VMEM-resident in the kernel
    w_r = jnp.transpose(weight, (2, 3, 4, 0, 1)).reshape(KD * KHW, Cout, Cin)
    w_r = jnp.pad(w_r, ((0, 0), (0, 0), (0, Cin_p - Cin))).astype(jnp.bfloat16)

    # validity mask over the M_pad flattened base positions: selects exactly the
    # Ho*Wo strided output positions (everything else is excluded from BN stats
    # and dropped by the final extraction).
    j = np.arange(M_pad)
    row, col = j // Wp, j % Wp
    valid = ((row % st[1] == 0) & (row // st[1] < Ho) &
             (col % st[2] == 0) & (col // st[2] < Wo))
    mask = jnp.asarray(valid.reshape(1, M_pad).astype(np.float32))

    # -------- pass 1: fused conv GEMMs + BatchNorm partial statistics ----------
    def conv_stats_kernel(*refs):
        x_refs = refs[:KD]                     # KD x (1, 1, Cin_p, HWp_arr) bf16
        w_ref, m_ref = refs[KD], refs[KD + 1]  # (KD*KHW, Cout, Cin_p), (1, M_pad)
        conv_ref, stats_ref = refs[KD + 2], refs[KD + 3]

        acc = None
        for kd in range(KD):                   # fully static tap loops
            plane = x_refs[kd][0, 0]           # (Cin_p, HWp_arr)
            for t in range(KHW):
                w_t = w_ref[kd * KHW + t]      # (Cout, Cin_p), static index
                win = plane[:, offs[t]:offs[t] + M_pad]        # (Cin_p, M_pad)
                d = jnp.dot(w_t, win, preferred_element_type=jnp.float32)
                acc = d if acc is None else acc + d            # f32 accumulate

        conv_ref[0] = acc.astype(conv_ref.dtype)               # bf16 intermediate
        am = acc * m_ref[...]                                  # mask invalid lanes
        s_ = jnp.sum(am, axis=1, keepdims=True)                # (Cout, 1)
        sq = jnp.sum(am * am, axis=1, keepdims=True)
        stats_ref[0, 0] = jnp.concatenate([s_, sq], axis=1)    # (Cout, 2)

    def _plane_spec(kd):
        def imap(n, do):
            # block size 1 along Dp => the block index is the element (plane) index
            return (n, do * st[0] + kd * dl[0], 0, 0)
        return pl.BlockSpec((1, 1, Cin_p, HWp_arr), imap)

    conv_out, stats = pl.pallas_call(
        conv_stats_kernel,
        out_shape=(jax.ShapeDtypeStruct((N, Cout, Do * M_pad), jnp.bfloat16),
                   jax.ShapeDtypeStruct((N, Do, Cout, 2), jnp.float32)),
        grid_spec=pltpu.PrefetchScalarGridSpec(
            num_scalar_prefetch=0,
            grid=(N, Do),
            in_specs=([_plane_spec(kd) for kd in range(KD)]
                      + [pl.BlockSpec((KD * KHW, Cout, Cin_p),
                                      lambda n, do: (0, 0, 0)),       # resident weights
                         pl.BlockSpec((1, M_pad), lambda n, do: (0, 0))]),
            out_specs=[pl.BlockSpec((1, Cout, M_pad), lambda n, do: (n, 0, do)),
                       pl.BlockSpec((1, 1, Cout, 2), lambda n, do: (n, do, 0, 0))]),
        compiler_params=pltpu.CompilerParams(
            dimension_semantics=("parallel", "parallel"),
            vmem_limit_bytes=32 * 1024 * 1024),
    )(*([xp] * KD), w_r, mask)

    # ------- fold statistics into per-channel scale/shift (tiny, host JAX) ------
    if is_batchnorm:
        sums = jnp.sum(stats, axis=(0, 1))                     # (Cout, 2)
        count = jnp.float32(N * Do * Ho * Wo)
        mean = sums[:, 0] / count
        var = jnp.maximum(sums[:, 1] / count - mean * mean, 0.0)   # biased variance
        scale = gamma.astype(jnp.float32) / jnp.sqrt(var + eps)
        shift = beta.astype(jnp.float32) - mean * scale        # conv bias cancels under BN
    else:
        scale = jnp.ones((Cout,), jnp.float32)
        shift = (bias.astype(jnp.float32) if bias is not None
                 else jnp.zeros((Cout,), jnp.float32))

    # ------------- pass 2: per-channel scale/shift (lane-dense tiles) -----------
    d_blk = 1
    for d in range(1, Do + 1):      # largest divisor of Do keeping the block ~<= 4 MiB
        if Do % d == 0 and Cout * d * M_pad * 4 <= 4 * 1024 * 1024:
            d_blk = d
    TM2 = d_blk * M_pad
    n_m2 = (Do * M_pad) // TM2

    def scale_shift_kernel(x_ref, sc_ref, sh_ref, o_ref):
        o_ref[0] = x_ref[0].astype(jnp.float32) * sc_ref[...] + sh_ref[...]

    out = pl.pallas_call(
        scale_shift_kernel,
        out_shape=jax.ShapeDtypeStruct((N, Cout, Do * M_pad), jnp.float32),
        grid_spec=pltpu.PrefetchScalarGridSpec(
            num_scalar_prefetch=0,
            grid=(N, n_m2),
            in_specs=[pl.BlockSpec((1, Cout, TM2), lambda n, i: (n, 0, i)),
                      pl.BlockSpec((Cout, 1), lambda n, i: (0, 0)),
                      pl.BlockSpec((Cout, 1), lambda n, i: (0, 0))],
            out_specs=pl.BlockSpec((1, Cout, TM2), lambda n, i: (n, 0, i))),
        compiler_params=pltpu.CompilerParams(
            dimension_semantics=("parallel", "parallel"),
            vmem_limit_bytes=32 * 1024 * 1024),
    )(conv_out, scale.reshape(Cout, 1), shift.reshape(Cout, 1))

    # channel-major, lane-padded layout -> NCDHW via a strided slice (no transpose)
    out = out.reshape(N, Cout, Do, M_pad)[..., :M_eff]
    out = jnp.pad(out, ((0, 0), (0, 0), (0, 0), (0, Ho * st[1] * Wp - M_eff)))
    out = out.reshape(N, Cout, Do, Ho, st[1] * Wp)[..., 0:(Wo - 1) * st[2] + 1:st[2]]
    return out


# --------------------------------- main -------------------------------------

if __name__ == "__main__":
    # module config: conv3DBatchNorm(in_channels=4, n_filters=8, k_size=3,
    #                                stride=1, padding=1, bias=True,
    #                                dilation=1, is_batchnorm=True)
    N, Cin, D, H, W = 2, 4, 8, 8, 8
    Cout, K = 8, 3
    eps = 1e-5

    key = jax.random.PRNGKey(0)
    kx, kw_, kb = jax.random.split(key, 3)

    x = jax.random.normal(kx, (N, Cin, D, H, W), dtype=jnp.float32)

    # deterministic Conv3d init (kaiming-uniform-style bounds, like PyTorch)
    fan_in = Cin * K * K * K
    bound = 1.0 / float(np.sqrt(fan_in))
    weight = jax.random.uniform(kw_, (Cout, Cin, K, K, K),
                                minval=-bound, maxval=bound, dtype=jnp.float32)
    bias = jax.random.uniform(kb, (Cout,),
                              minval=-bound, maxval=bound, dtype=jnp.float32)
    # BatchNorm3d default init: gamma = 1, beta = 0
    gamma = jnp.ones((Cout,), jnp.float32)
    beta = jnp.zeros((Cout,), jnp.float32)

    y = conv3d_batchnorm_forward(x, weight, bias, gamma, beta,
                                 stride=1, padding=1, dilation=1,
                                 eps=eps, is_batchnorm=True)
    y = jax.block_until_ready(y)

    # reference: XLA f32 conv + training-mode (batch-statistics) BatchNorm3d
    ref_conv = jax.lax.conv_general_dilated(
        x, weight, window_strides=(1, 1, 1),
        padding=((1, 1), (1, 1), (1, 1)),
        rhs_dilation=(1, 1, 1),
        dimension_numbers=("NCDHW", "OIDHW", "NCDHW"),
        precision=jax.lax.Precision.HIGHEST,
    ) + bias.reshape(1, Cout, 1, 1, 1)
    m = ref_conv.mean(axis=(0, 2, 3, 4), keepdims=True)
    v = ref_conv.var(axis=(0, 2, 3, 4), keepdims=True)
    ref = ((ref_conv - m) / jnp.sqrt(v + eps)
           * gamma.reshape(1, Cout, 1, 1, 1) + beta.reshape(1, Cout, 1, 1, 1))

    assert y.shape == (N, Cout, D, H, W), y.shape
    # tolerance accounts for bf16 conv inputs/weights and the bf16 intermediate
    # (f32 accumulation) vs the f32 reference
    err = float(jnp.max(jnp.abs(y - ref)))
    assert jnp.allclose(y, ref, atol=3e-2, rtol=3e-2), err

    print("KERNEL_OK")
</pallas_src>

<mosaic_0001>
module attributes {stable_mosaic.version = 11 : i64} {
  func.func @conv_stats_kernel(%arg0: i32, %arg1: i32, %arg2: memref<1x1x8x150xbf16, #tpu.memory_space<vmem>>, %arg3: memref<1x1x8x150xbf16, #tpu.memory_space<vmem>>, %arg4: memref<1x1x8x150xbf16, #tpu.memory_space<vmem>>, %arg5: memref<27x8x8xbf16, #tpu.memory_space<vmem>>, %arg6: memref<1x128xf32, #tpu.memory_space<vmem>>, %arg7: memref<1x8x128xbf16, #tpu.memory_space<vmem>>, %arg8: memref<1x1x8x2xf32, #tpu.memory_space<vmem>>) attributes {dimension_semantics = [#tpu.dimension_semantics<parallel>, #tpu.dimension_semantics<parallel>], iteration_bounds = array<i64: 2, 8>, scalar_prefetch = 0 : i64, scratch_operands = 0 : i64, tpu.core_type = #tpu.core_type<tc>, window_params = [{transform_indices = @transform_0, window_bounds = array<i64: 1, 1, 8, 150>}, {transform_indices = @transform_1, window_bounds = array<i64: 1, 1, 8, 150>}, {transform_indices = @transform_2, window_bounds = array<i64: 1, 1, 8, 150>}, {pipeline_mode = #tpu.pipeline_mode<synchronous>, transform_indices = @transform_3, window_bounds = array<i64: 27, 8, 8>}, {pipeline_mode = #tpu.pipeline_mode<synchronous>, transform_indices = @transform_4, window_bounds = array<i64: 1, 128>}, {transform_indices = @transform_5, window_bounds = array<i64: 1, 8, 128>}, {transform_indices = @transform_6, window_bounds = array<i64: 1, 1, 8, 2>}]} {
    %c0 = arith.constant 0 : index
    %c0_0 = arith.constant 0 : index
    %c0_1 = arith.constant 0 : index
    %c0_2 = arith.constant 0 : index
    %0 = vector.load %arg2[%c0, %c0_0, %c0_1, %c0_2] : memref<1x1x8x150xbf16, #tpu.memory_space<vmem>>, vector<1x1x8x150xbf16>
    %1 = vector.shape_cast %0 : vector<1x1x8x150xbf16> to vector<8x150xbf16>
    %c0_3 = arith.constant 0 : index
    %c0_4 = arith.constant 0 : index
    %c0_5 = arith.constant 0 : index
    %2 = vector.load %arg5[%c0_3, %c0_4, %c0_5] : memref<27x8x8xbf16, #tpu.memory_space<vmem>>, vector<1x8x8xbf16>
    %3 = vector.shape_cast %2 : vector<1x8x8xbf16> to vector<8x8xbf16>
    %4 = vector.extract_strided_slice %1 {offsets = [0, 0], sizes = [8, 128], strides = [1, 1]} : vector<8x150xbf16> to vector<8x128xbf16>
    %cst = arith.constant dense<0.000000e+00> : vector<8x128xf32>
    %5 = tpu.matmul %3, %4, %cst {dimension_numbers = #tpu.dot_dimension_numbers<[1], [0], [0], [1], [0, 0, 1, 1], [], []>} : vector<8x8xbf16>, vector<8x128xbf16>, vector<8x128xf32> -> vector<8x128xf32>
    %c1 = arith.constant 1 : index
    %c0_6 = arith.constant 0 : index
    %c0_7 = arith.constant 0 : index
    %6 = vector.load %arg5[%c1, %c0_6, %c0_7] : memref<27x8x8xbf16, #tpu.memory_space<vmem>>, vector<1x8x8xbf16>
    %7 = vector.shape_cast %6 : vector<1x8x8xbf16> to vector<8x8xbf16>
    %8 = vector.extract_strided_slice %1 {offsets = [0, 1], sizes = [8, 128], strides = [1, 1]} : vector<8x150xbf16> to vector<8x128xbf16>
    %cst_8 = arith.constant dense<0.000000e+00> : vector<8x128xf32>
    %9 = tpu.matmul %7, %8, %cst_8 {dimension_numbers = #tpu.dot_dimension_numbers<[1], [0], [0], [1], [0, 0, 1, 1], [], []>} : vector<8x8xbf16>, vector<8x128xbf16>, vector<8x128xf32> -> vector<8x128xf32>
    %10 = arith.addf %5, %9 : vector<8x128xf32>
    %c2 = arith.constant 2 : index
    %c0_9 = arith.constant 0 : index
    %c0_10 = arith.constant 0 : index
    %11 = vector.load %arg5[%c2, %c0_9, %c0_10] : memref<27x8x8xbf16, #tpu.memory_space<vmem>>, vector<1x8x8xbf16>
    %12 = vector.shape_cast %11 : vector<1x8x8xbf16> to vector<8x8xbf16>
    %13 = vector.extract_strided_slice %1 {offsets = [0, 2], sizes = [8, 128], strides = [1, 1]} : vector<8x150xbf16> to vector<8x128xbf16>
    %cst_11 = arith.constant dense<0.000000e+00> : vector<8x128xf32>
    %14 = tpu.matmul %12, %13, %cst_11 {dimension_numbers = #tpu.dot_dimension_numbers<[1], [0], [0], [1], [0, 0, 1, 1], [], []>} : vector<8x8xbf16>, vector<8x128xbf16>, vector<8x128xf32> -> vector<8x128xf32>
    %15 = arith.addf %10, %14 : vector<8x128xf32>
    %c3 = arith.constant 3 : index
    %c0_12 = arith.constant 0 : index
    %c0_13 = arith.constant 0 : index
    %16 = vector.load %arg5[%c3, %c0_12, %c0_13] : memref<27x8x8xbf16, #tpu.memory_space<vmem>>, vector<1x8x8xbf16>
    %17 = vector.shape_cast %16 : vector<1x8x8xbf16> to vector<8x8xbf16>
    %18 = vector.extract_strided_slice %1 {offsets = [0, 10], sizes = [8, 128], strides = [1, 1]} : vector<8x150xbf16> to vector<8x128xbf16>
    %cst_14 = arith.constant dense<0.000000e+00> : vector<8x128xf32>
    %19 = tpu.matmul %17, %18, %cst_14 {dimension_numbers = #tpu.dot_dimension_numbers<[1], [0], [0], [1], [0, 0, 1, 1], [], []>} : vector<8x8xbf16>, vector<8x128xbf16>, vector<8x128xf32> -> vector<8x128xf32>
    %20 = arith.addf %15, %19 : vector<8x128xf32>
    %c4 = arith.constant 4 : index
    %c0_15 = arith.constant 0 : index
    %c0_16 = arith.constant 0 : index
    %21 = vector.load %arg5[%c4, %c0_15, %c0_16] : memref<27x8x8xbf16, #tpu.memory_space<vmem>>, vector<1x8x8xbf16>
    %22 = vector.shape_cast %21 : vector<1x8x8xbf16> to vector<8x8xbf16>
    %23 = vector.extract_strided_slice %1 {offsets = [0, 11], sizes = [8, 128], strides = [1, 1]} : vector<8x150xbf16> to vector<8x128xbf16>
    %cst_17 = arith.constant dense<0.000000e+00> : vector<8x128xf32>
    %24 = tpu.matmul %22, %23, %cst_17 {dimension_numbers = #tpu.dot_dimension_numbers<[1], [0], [0], [1], [0, 0, 1, 1], [], []>} : vector<8x8xbf16>, vector<8x128xbf16>, vector<8x128xf32> -> vector<8x128xf32>
    %25 = arith.addf %20, %24 : vector<8x128xf32>
    %c5 = arith.constant 5 : index
    %c0_18 = arith.constant 0 : index
    %c0_19 = arith.constant 0 : index
    %26 = vector.load %arg5[%c5, %c0_18, %c0_19] : memref<27x8x8xbf16, #tpu.memory_space<vmem>>, vector<1x8x8xbf16>
    %27 = vector.shape_cast %26 : vector<1x8x8xbf16> to vector<8x8xbf16>
    %28 = vector.extract_strided_slice %1 {offsets = [0, 12], sizes = [8, 128], strides = [1, 1]} : vector<8x150xbf16> to vector<8x128xbf16>
    %cst_20 = arith.constant dense<0.000000e+00> : vector<8x128xf32>
    %29 = tpu.matmul %27, %28, %cst_20 {dimension_numbers = #tpu.dot_dimension_numbers<[1], [0], [0], [1], [0, 0, 1, 1], [], []>} : vector<8x8xbf16>, vector<8x128xbf16>, vector<8x128xf32> -> vector<8x128xf32>
    %30 = arith.addf %25, %29 : vector<8x128xf32>
    %c6 = arith.constant 6 : index
    %c0_21 = arith.constant 0 : index
    %c0_22 = arith.constant 0 : index
    %31 = vector.load %arg5[%c6, %c0_21, %c0_22] : memref<27x8x8xbf16, #tpu.memory_space<vmem>>, vector<1x8x8xbf16>
    %32 = vector.shape_cast %31 : vector<1x8x8xbf16> to vector<8x8xbf16>
    %33 = vector.extract_strided_slice %1 {offsets = [0, 20], sizes = [8, 128], strides = [1, 1]} : vector<8x150xbf16> to vector<8x128xbf16>
    %cst_23 = arith.constant dense<0.000000e+00> : vector<8x128xf32>
    %34 = tpu.matmul %32, %33, %cst_23 {dimension_numbers = #tpu.dot_dimension_numbers<[1], [0], [0], [1], [0, 0, 1, 1], [], []>} : vector<8x8xbf16>, vector<8x128xbf16>, vector<8x128xf32> -> vector<8x128xf32>
    %35 = arith.addf %30, %34 : vector<8x128xf32>
    %c7 = arith.constant 7 : index
    %c0_24 = arith.constant 0 : index
    %c0_25 = arith.constant 0 : index
    %36 = vector.load %arg5[%c7, %c0_24, %c0_25] : memref<27x8x8xbf16, #tpu.memory_space<vmem>>, vector<1x8x8xbf16>
    %37 = vector.shape_cast %36 : vector<1x8x8xbf16> to vector<8x8xbf16>
    %38 = vector.extract_strided_slice %1 {offsets = [0, 21], sizes = [8, 128], strides = [1, 1]} : vector<8x150xbf16> to vector<8x128xbf16>
    %cst_26 = arith.constant dense<0.000000e+00> : vector<8x128xf32>
    %39 = tpu.matmul %37, %38, %cst_26 {dimension_numbers = #tpu.dot_dimension_numbers<[1], [0], [0], [1], [0, 0, 1, 1], [], []>} : vector<8x8xbf16>, vector<8x128xbf16>, vector<8x128xf32> -> vector<8x128xf32>
    %40 = arith.addf %35, %39 : vector<8x128xf32>
    %c8 = arith.constant 8 : index
    %c0_27 = arith.constant 0 : index
    %c0_28 = arith.constant 0 : index
    %41 = vector.load %arg5[%c8, %c0_27, %c0_28] : memref<27x8x8xbf16, #tpu.memory_space<vmem>>, vector<1x8x8xbf16>
    %42 = vector.shape_cast %41 : vector<1x8x8xbf16> to vector<8x8xbf16>
    %43 = vector.extract_strided_slice %1 {offsets = [0, 22], sizes = [8, 128], strides = [1, 1]} : vector<8x150xbf16> to vector<8x128xbf16>
    %cst_29 = arith.constant dense<0.000000e+00> : vector<8x128xf32>
    %44 = tpu.matmul %42, %43, %cst_29 {dimension_numbers = #tpu.dot_dimension_numbers<[1], [0], [0], [1], [0, 0, 1, 1], [], []>} : vector<8x8xbf16>, vector<8x128xbf16>, vector<8x128xf32> -> vector<8x128xf32>
    %45 = arith.addf %40, %44 : vector<8x128xf32>
    %c0_30 = arith.constant 0 : index
    %c0_31 = arith.constant 0 : index
    %c0_32 = arith.constant 0 : index
    %c0_33 = arith.constant 0 : index
    %46 = vector.load %arg3[%c0_30, %c0_31, %c0_32, %c0_33] : memref<1x1x8x150xbf16, #tpu.memory_space<vmem>>, vector<1x1x8x150xbf16>
    %47 = vector.shape_cast %46 : vector<1x1x8x150xbf16> to vector<8x150xbf16>
    %c9 = arith.constant 9 : index
    %c0_34 = arith.constant 0 : index
    %c0_35 = arith.constant 0 : index
    %48 = vector.load %arg5[%c9, %c0_34, %c0_35] : memref<27x8x8xbf16, #tpu.memory_space<vmem>>, vector<1x8x8xbf16>
    %49 = vector.shape_cast %48 : vector<1x8x8xbf16> to vector<8x8xbf16>
    %50 = vector.extract_strided_slice %47 {offsets = [0, 0], sizes = [8, 128], strides = [1, 1]} : vector<8x150xbf16> to vector<8x128xbf16>
    %cst_36 = arith.constant dense<0.000000e+00> : vector<8x128xf32>
    %51 = tpu.matmul %49, %50, %cst_36 {dimension_numbers = #tpu.dot_dimension_numbers<[1], [0], [0], [1], [0, 0, 1, 1], [], []>} : vector<8x8xbf16>, vector<8x128xbf16>, vector<8x128xf32> -> vector<8x128xf32>
    %52 = arith.addf %45, %51 : vector<8x128xf32>
    %c10 = arith.constant 10 : index
    %c0_37 = arith.constant 0 : index
    %c0_38 = arith.constant 0 : index
    %53 = vector.load %arg5[%c10, %c0_37, %c0_38] : memref<27x8x8xbf16, #tpu.memory_space<vmem>>, vector<1x8x8xbf16>
    %54 = vector.shape_cast %53 : vector<1x8x8xbf16> to vector<8x8xbf16>
    %55 = vector.extract_strided_slice %47 {offsets = [0, 1], sizes = [8, 128], strides = [1, 1]} : vector<8x150xbf16> to vector<8x128xbf16>
    %cst_39 = arith.constant dense<0.000000e+00> : vector<8x128xf32>
    %56 = tpu.matmul %54, %55, %cst_39 {dimension_numbers = #tpu.dot_dimension_numbers<[1], [0], [0], [1], [0, 0, 1, 1], [], []>} : vector<8x8xbf16>, vector<8x128xbf16>, vector<8x128xf32> -> vector<8x128xf32>
    %57 = arith.addf %52, %56 : vector<8x128xf32>
    %c11 = arith.constant 11 : index
    %c0_40 = arith.constant 0 : index
    %c0_41 = arith.constant 0 : index
    %58 = vector.load %arg5[%c11, %c0_40, %c0_41] : memref<27x8x8xbf16, #tpu.memory_space<vmem>>, vector<1x8x8xbf16>
    %59 = vector.shape_cast %58 : vector<1x8x8xbf16> to vector<8x8xbf16>
    %60 = vector.extract_strided_slice %47 {offsets = [0, 2], sizes = [8, 128], strides = [1, 1]} : vector<8x150xbf16> to vector<8x128xbf16>
    %cst_42 = arith.constant dense<0.000000e+00> : vector<8x128xf32>
    %61 = tpu.matmul %59, %60, %cst_42 {dimension_numbers = #tpu.dot_dimension_numbers<[1], [0], [0], [1], [0, 0, 1, 1], [], []>} : vector<8x8xbf16>, vector<8x128xbf16>, vector<8x128xf32> -> vector<8x128xf32>
    %62 = arith.addf %57, %61 : vector<8x128xf32>
    %c12 = arith.constant 12 : index
    %c0_43 = arith.constant 0 : index
    %c0_44 = arith.constant 0 : index
    %63 = vector.load %arg5[%c12, %c0_43, %c0_44] : memref<27x8x8xbf16, #tpu.memory_space<vmem>>, vector<1x8x8xbf16>
    %64 = vector.shape_cast %63 : vector<1x8x8xbf16> to vector<8x8xbf16>
    %65 = vector.extract_strided_slice %47 {offsets = [0, 10], sizes = [8, 128], strides = [1, 1]} : vector<8x150xbf16> to vector<8x128xbf16>
    %cst_45 = arith.constant dense<0.000000e+00> : vector<8x128xf32>
    %66 = tpu.matmul %64, %65, %cst_45 {dimension_numbers = #tpu.dot_dimension_numbers<[1], [0], [0], [1], [0, 0, 1, 1], [], []>} : vector<8x8xbf16>, vector<8x128xbf16>, vector<8x128xf32> -> vector<8x128xf32>
    %67 = arith.addf %62, %66 : vector<8x128xf32>
    %c13 = arith.constant 13 : index
    %c0_46 = arith.constant 0 : index
    %c0_47 = arith.constant 0 : index
    %68 = vector.load %arg5[%c13, %c0_46, %c0_47] : memref<27x8x8xbf16, #tpu.memory_space<vmem>>, vector<1x8x8xbf16>
    %69 = vector.shape_cast %68 : vector<1x8x8xbf16> to vector<8x8xbf16>
    %70 = vector.extract_strided_slice %47 {offsets = [0, 11], sizes = [8, 128], strides = [1, 1]} : vector<8x150xbf16> to vector<8x128xbf16>
    %cst_48 = arith.constant dense<0.000000e+00> : vector<8x128xf32>
    %71 = tpu.matmul %69, %70, %cst_48 {dimension_numbers = #tpu.dot_dimension_numbers<[1], [0], [0], [1], [0, 0, 1, 1], [], []>} : vector<8x8xbf16>, vector<8x128xbf16>, vector<8x128xf32> -> vector<8x128xf32>
    %72 = arith.addf %67, %71 : vector<8x128xf32>
    %c14 = arith.constant 14 : index
    %c0_49 = arith.constant 0 : index
    %c0_50 = arith.constant 0 : index
    %73 = vector.load %arg5[%c14, %c0_49, %c0_50] : memref<27x8x8xbf16, #tpu.memory_space<vmem>>, vector<1x8x8xbf16>
    %74 = vector.shape_cast %73 : vector<1x8x8xbf16> to vector<8x8xbf16>
    %75 = vector.extract_strided_slice %47 {offsets = [0, 12], sizes = [8, 128], strides = [1, 1]} : vector<8x150xbf16> to vector<8x128xbf16>
    %cst_51 = arith.constant dense<0.000000e+00> : vector<8x128xf32>
    %76 = tpu.matmul %74, %75, %cst_51 {dimension_numbers = #tpu.dot_dimension_numbers<[1], [0], [0], [1], [0, 0, 1, 1], [], []>} : vector<8x8xbf16>, vector<8x128xbf16>, vector<8x128xf32> -> vector<8x128xf32>
    %77 = arith.addf %72, %76 : vector<8x128xf32>
    %c15 = arith.constant 15 : index
    %c0_52 = arith.constant 0 : index
    %c0_53 = arith.constant 0 : index
    %78 = vector.load %arg5[%c15, %c0_52, %c0_53] : memref<27x8x8xbf16, #tpu.memory_space<vmem>>, vector<1x8x8xbf16>
    %79 = vector.shape_cast %78 : vector<1x8x8xbf16> to vector<8x8xbf16>
    %80 = vector.extract_strided_slice %47 {offsets = [0, 20], sizes = [8, 128], strides = [1, 1]} : vector<8x150xbf16> to vector<8x128xbf16>
    %cst_54 = arith.constant dense<0.000000e+00> : vector<8x128xf32>
    %81 = tpu.matmul %79, %80, %cst_54 {dimension_numbers = #tpu.dot_dimension_numbers<[1], [0], [0], [1], [0, 0, 1, 1], [], []>} : vector<8x8xbf16>, vector<8x128xbf16>, vector<8x128xf32> -> vector<8x128xf32>
    %82 = arith.addf %77, %81 : vector<8x128xf32>
    %c16 = arith.constant 16 : index
    %c0_55 = arith.constant 0 : index
    %c0_56 = arith.constant 0 : index
    %83 = vector.load %arg5[%c16, %c0_55, %c0_56] : memref<27x8x8xbf16, #tpu.memory_space<vmem>>, vector<1x8x8xbf16>
    %84 = vector.shape_cast %83 : vector<1x8x8xbf16> to vector<8x8xbf16>
    %85 = vector.extract_strided_slice %47 {offsets = [0, 21], sizes = [8, 128], strides = [1, 1]} : vector<8x150xbf16> to vector<8x128xbf16>
    %cst_57 = arith.constant dense<0.000000e+00> : vector<8x128xf32>
    %86 = tpu.matmul %84, %85, %cst_57 {dimension_numbers = #tpu.dot_dimension_numbers<[1], [0], [0], [1], [0, 0, 1, 1], [], []>} : vector<8x8xbf16>, vector<8x128xbf16>, vector<8x128xf32> -> vector<8x128xf32>
    %87 = arith.addf %82, %86 : vector<8x128xf32>
    %c17 = arith.constant 17 : index
    %c0_58 = arith.constant 0 : index
    %c0_59 = arith.constant 0 : index
    %88 = vector.load %arg5[%c17, %c0_58, %c0_59] : memref<27x8x8xbf16, #tpu.memory_space<vmem>>, vector<1x8x8xbf16>
    %89 = vector.shape_cast %88 : vector<1x8x8xbf16> to vector<8x8xbf16>
    %90 = vector.extract_strided_slice %47 {offsets = [0, 22], sizes = [8, 128], strides = [1, 1]} : vector<8x150xbf16> to vector<8x128xbf16>
    %cst_60 = arith.constant dense<0.000000e+00> : vector<8x128xf32>
    %91 = tpu.matmul %89, %90, %cst_60 {dimension_numbers = #tpu.dot_dimension_numbers<[1], [0], [0], [1], [0, 0, 1, 1], [], []>} : vector<8x8xbf16>, vector<8x128xbf16>, vector<8x128xf32> -> vector<8x128xf32>
    %92 = arith.addf %87, %91 : vector<8x128xf32>
    %c0_61 = arith.constant 0 : index
    %c0_62 = arith.constant 0 : index
    %c0_63 = arith.constant 0 : index
    %c0_64 = arith.constant 0 : index
    %93 = vector.load %arg4[%c0_61, %c0_62, %c0_63, %c0_64] : memref<1x1x8x150xbf16, #tpu.memory_space<vmem>>, vector<1x1x8x150xbf16>
    %94 = vector.shape_cast %93 : vector<1x1x8x150xbf16> to vector<8x150xbf16>
    %c18 = arith.constant 18 : index
    %c0_65 = arith.constant 0 : index
    %c0_66 = arith.constant 0 : index
    %95 = vector.load %arg5[%c18, %c0_65, %c0_66] : memref<27x8x8xbf16, #tpu.memory_space<vmem>>, vector<1x8x8xbf16>
    %96 = vector.shape_cast %95 : vector<1x8x8xbf16> to vector<8x8xbf16>
    %97 = vector.extract_strided_slice %94 {offsets = [0, 0], sizes = [8, 128], strides = [1, 1]} : vector<8x150xbf16> to vector<8x128xbf16>
    %cst_67 = arith.constant dense<0.000000e+00> : vector<8x128xf32>
    %98 = tpu.matmul %96, %97, %cst_67 {dimension_numbers = #tpu.dot_dimension_numbers<[1], [0], [0], [1], [0, 0, 1, 1], [], []>} : vector<8x8xbf16>, vector<8x128xbf16>, vector<8x128xf32> -> vector<8x128xf32>
    %99 = arith.addf %92, %98 : vector<8x128xf32>
    %c19 = arith.constant 19 : index
    %c0_68 = arith.constant 0 : index
    %c0_69 = arith.constant 0 : index
    %100 = vector.load %arg5[%c19, %c0_68, %c0_69] : memref<27x8x8xbf16, #tpu.memory_space<vmem>>, vector<1x8x8xbf16>
    %101 = vector.shape_cast %100 : vector<1x8x8xbf16> to vector<8x8xbf16>
    %102 = vector.extract_strided_slice %94 {offsets = [0, 1], sizes = [8, 128], strides = [1, 1]} : vector<8x150xbf16> to vector<8x128xbf16>
    %cst_70 = arith.constant dense<0.000000e+00> : vector<8x128xf32>
    %103 = tpu.matmul %101, %102, %cst_70 {dimension_numbers = #tpu.dot_dimension_numbers<[1], [0], [0], [1], [0, 0, 1, 1], [], []>} : vector<8x8xbf16>, vector<8x128xbf16>, vector<8x128xf32> -> vector<8x128xf32>
    %104 = arith.addf %99, %103 : vector<8x128xf32>
    %c20 = arith.constant 20 : index
    %c0_71 = arith.constant 0 : index
    %c0_72 = arith.constant 0 : index
    %105 = vector.load %arg5[%c20, %c0_71, %c0_72] : memref<27x8x8xbf16, #tpu.memory_space<vmem>>, vector<1x8x8xbf16>
    %106 = vector.shape_cast %105 : vector<1x8x8xbf16> to vector<8x8xbf16>
    %107 = vector.extract_strided_slice %94 {offsets = [0, 2], sizes = [8, 128], strides = [1, 1]} : vector<8x150xbf16> to vector<8x128xbf16>
    %cst_73 = arith.constant dense<0.000000e+00> : vector<8x128xf32>
    %108 = tpu.matmul %106, %107, %cst_73 {dimension_numbers = #tpu.dot_dimension_numbers<[1], [0], [0], [1], [0, 0, 1, 1], [], []>} : vector<8x8xbf16>, vector<8x128xbf16>, vector<8x128xf32> -> vector<8x128xf32>
    %109 = arith.addf %104, %108 : vector<8x128xf32>
    %c21 = arith.constant 21 : index
    %c0_74 = arith.constant 0 : index
    %c0_75 = arith.constant 0 : index
    %110 = vector.load %arg5[%c21, %c0_74, %c0_75] : memref<27x8x8xbf16, #tpu.memory_space<vmem>>, vector<1x8x8xbf16>
    %111 = vector.shape_cast %110 : vector<1x8x8xbf16> to vector<8x8xbf16>
    %112 = vector.extract_strided_slice %94 {offsets = [0, 10], sizes = [8, 128], strides = [1, 1]} : vector<8x150xbf16> to vector<8x128xbf16>
    %cst_76 = arith.constant dense<0.000000e+00> : vector<8x128xf32>
    %113 = tpu.matmul %111, %112, %cst_76 {dimension_numbers = #tpu.dot_dimension_numbers<[1], [0], [0], [1], [0, 0, 1, 1], [], []>} : vector<8x8xbf16>, vector<8x128xbf16>, vector<8x128xf32> -> vector<8x128xf32>
    %114 = arith.addf %109, %113 : vector<8x128xf32>
    %c22 = arith.constant 22 : index
    %c0_77 = arith.constant 0 : index
    %c0_78 = arith.constant 0 : index
    %115 = vector.load %arg5[%c22, %c0_77, %c0_78] : memref<27x8x8xbf16, #tpu.memory_space<vmem>>, vector<1x8x8xbf16>
    %116 = vector.shape_cast %115 : vector<1x8x8xbf16> to vector<8x8xbf16>
    %117 = vector.extract_strided_slice %94 {offsets = [0, 11], sizes = [8, 128], strides = [1, 1]} : vector<8x150xbf16> to vector<8x128xbf16>
    %cst_79 = arith.constant dense<0.000000e+00> : vector<8x128xf32>
    %118 = tpu.matmul %116, %117, %cst_79 {dimension_numbers = #tpu.dot_dimension_numbers<[1], [0], [0], [1], [0, 0, 1, 1], [], []>} : vector<8x8xbf16>, vector<8x128xbf16>, vector<8x128xf32> -> vector<8x128xf32>
    %119 = arith.addf %114, %118 : vector<8x128xf32>
    %c23 = arith.constant 23 : index
    %c0_80 = arith.constant 0 : index
    %c0_81 = arith.constant 0 : index
    %120 = vector.load %arg5[%c23, %c0_80, %c0_81] : memref<27x8x8xbf16, #tpu.memory_space<vmem>>, vector<1x8x8xbf16>
    %121 = vector.shape_cast %120 : vector<1x8x8xbf16> to vector<8x8xbf16>
    %122 = vector.extract_strided_slice %94 {offsets = [0, 12], sizes = [8, 128], strides = [1, 1]} : vector<8x150xbf16> to vector<8x128xbf16>
    %cst_82 = arith.constant dense<0.000000e+00> : vector<8x128xf32>
    %123 = tpu.matmul %121, %122, %cst_82 {dimension_numbers = #tpu.dot_dimension_numbers<[1], [0], [0], [1], [0, 0, 1, 1], [], []>} : vector<8x8xbf16>, vector<8x128xbf16>, vector<8x128xf32> -> vector<8x128xf32>
    %124 = arith.addf %119, %123 : vector<8x128xf32>
    %c24 = arith.constant 24 : index
    %c0_83 = arith.constant 0 : index
    %c0_84 = arith.constant 0 : index
    %125 = vector.load %arg5[%c24, %c0_83, %c0_84] : memref<27x8x8xbf16, #tpu.memory_space<vmem>>, vector<1x8x8xbf16>
    %126 = vector.shape_cast %125 : vector<1x8x8xbf16> to vector<8x8xbf16>
    %127 = vector.extract_strided_slice %94 {offsets = [0, 20], sizes = [8, 128], strides = [1, 1]} : vector<8x150xbf16> to vector<8x128xbf16>
    %cst_85 = arith.constant dense<0.000000e+00> : vector<8x128xf32>
    %128 = tpu.matmul %126, %127, %cst_85 {dimension_numbers = #tpu.dot_dimension_numbers<[1], [0], [0], [1], [0, 0, 1, 1], [], []>} : vector<8x8xbf16>, vector<8x128xbf16>, vector<8x128xf32> -> vector<8x128xf32>
    %129 = arith.addf %124, %128 : vector<8x128xf32>
    %c25 = arith.constant 25 : index
    %c0_86 = arith.constant 0 : index
    %c0_87 = arith.constant 0 : index
    %130 = vector.load %arg5[%c25, %c0_86, %c0_87] : memref<27x8x8xbf16, #tpu.memory_space<vmem>>, vector<1x8x8xbf16>
    %131 = vector.shape_cast %130 : vector<1x8x8xbf16> to vector<8x8xbf16>
    %132 = vector.extract_strided_slice %94 {offsets = [0, 21], sizes = [8, 128], strides = [1, 1]} : vector<8x150xbf16> to vector<8x128xbf16>
    %cst_88 = arith.constant dense<0.000000e+00> : vector<8x128xf32>
    %133 = tpu.matmul %131, %132, %cst_88 {dimension_numbers = #tpu.dot_dimension_numbers<[1], [0], [0], [1], [0, 0, 1, 1], [], []>} : vector<8x8xbf16>, vector<8x128xbf16>, vector<8x128xf32> -> vector<8x128xf32>
    %134 = arith.addf %129, %133 : vector<8x128xf32>
    %c26 = arith.constant 26 : index
    %c0_89 = arith.constant 0 : index
    %c0_90 = arith.constant 0 : index
    %135 = vector.load %arg5[%c26, %c0_89, %c0_90] : memref<27x8x8xbf16, #tpu.memory_space<vmem>>, vector<1x8x8xbf16>
    %136 = vector.shape_cast %135 : vector<1x8x8xbf16> to vector<8x8xbf16>
    %137 = vector.extract_strided_slice %94 {offsets = [0, 22], sizes = [8, 128], strides = [1, 1]} : vector<8x150xbf16> to vector<8x128xbf16>
    %cst_91 = arith.constant dense<0.000000e+00> : vector<8x128xf32>
    %138 = tpu.matmul %136, %137, %cst_91 {dimension_numbers = #tpu.dot_dimension_numbers<[1], [0], [0], [1], [0, 0, 1, 1], [], []>} : vector<8x8xbf16>, vector<8x128xbf16>, vector<8x128xf32> -> vector<8x128xf32>
    %139 = arith.addf %134, %138 : vector<8x128xf32>
    %140 = arith.truncf %139 : vector<8x128xf32> to vector<8x128xbf16>
    %c0_92 = arith.constant 0 : index
    %c0_93 = arith.constant 0 : index
    %c0_94 = arith.constant 0 : index
    %141 = vector.load %arg7[%c0_92, %c0_93, %c0_94] : memref<1x8x128xbf16, #tpu.memory_space<vmem>>, vector<1x8x128xbf16>
    %142 = vector.shape_cast %141 : vector<1x8x128xbf16> to vector<8x128xbf16>
    %143 = vector.shape_cast %140 : vector<8x128xbf16> to vector<1x8x128xbf16>
    tpu.vector_store %arg7[%c0_92, %c0_93, %c0_94], %143 {strides = array<i32>} : memref<1x8x128xbf16, #tpu.memory_space<vmem>>, vector<1x8x128xbf16>,
    %c0_95 = arith.constant 0 : index
    %c0_96 = arith.constant 0 : index
    %144 = vector.load %arg6[%c0_95, %c0_96] : memref<1x128xf32, #tpu.memory_space<vmem>>, vector<1x128xf32>
    %145 = vector.broadcast %144 : vector<1x128xf32> to vector<8x128xf32>
    %146 = arith.mulf %139, %145 : vector<8x128xf32>
    %cst_97 = arith.constant dense<0.000000e+00> : vector<8xf32>
    %147 = vector.multi_reduction <add>, %146, %cst_97 [1] : vector<8x128xf32> to vector<8xf32>
    %148 = vector.shape_cast %147 : vector<8xf32> to vector<8x1xf32>
    %149 = arith.mulf %146, %146 : vector<8x128xf32>
    %cst_98 = arith.constant dense<0.000000e+00> : vector<8xf32>
    %150 = vector.multi_reduction <add>, %149, %cst_98 [1] : vector<8x128xf32> to vector<8xf32>
    %151 = vector.shape_cast %150 : vector<8xf32> to vector<8x1xf32>
    %152 = tpu.concatenate %148, %151 in 1 : vector<8x1xf32>, vector<8x1xf32> -> vector<8x2xf32>
    %c0_99 = arith.constant 0 : index
    %c0_100 = arith.constant 0 : index
    %c0_101 = arith.constant 0 : index
    %c0_102 = arith.constant 0 : index
    %153 = vector.load %arg8[%c0_99, %c0_100, %c0_101, %c0_102] : memref<1x1x8x2xf32, #tpu.memory_space<vmem>>, vector<1x1x8x2xf32>
    %154 = vector.shape_cast %153 : vector<1x1x8x2xf32> to vector<8x2xf32>
    %155 = vector.shape_cast %152 : vector<8x2xf32> to vector<1x1x8x2xf32>
    tpu.vector_store %arg8[%c0_99, %c0_100, %c0_101, %c0_102], %155 {strides = array<i32>} : memref<1x1x8x2xf32, #tpu.memory_space<vmem>>, vector<1x1x8x2xf32>,
    return
  }
  func.func @transform_0(%arg0: i32, %arg1: i32) -> (i32, i32, i32, i32) {
    %c1_i32 = arith.constant 1 : i32
    %0 = arith.muli %arg1, %c1_i32 : i32
    %c0_i32 = arith.constant 0 : i32
    %1 = arith.addi %0, %c0_i32 : i32
    %c0_i32_0 = arith.constant 0 : i32
    %c0_i32_1 = arith.constant 0 : i32
    %c0_i32_2 = arith.constant 0 : i32
    return %arg0, %1, %c0_i32_0, %c0_i32_1 : i32, i32, i32, i32
  }
  func.func @transform_1(%arg0: i32, %arg1: i32) -> (i32, i32, i32, i32) {
    %c1_i32 = arith.constant 1 : i32
    %0 = arith.muli %arg1, %c1_i32 : i32
    %c1_i32_0 = arith.constant 1 : i32
    %1 = arith.addi %0, %c1_i32_0 : i32
    %c0_i32 = arith.constant 0 : i32
    %c0_i32_1 = arith.constant 0 : i32
    %c0_i32_2 = arith.constant 0 : i32
    return %arg0, %1, %c0_i32, %c0_i32_1 : i32, i32, i32, i32
  }
  func.func @transform_2(%arg0: i32, %arg1: i32) -> (i32, i32, i32, i32) {
    %c1_i32 = arith.constant 1 : i32
    %0 = arith.muli %arg1, %c1_i32 : i32
    %c2_i32 = arith.constant 2 : i32
    %1 = arith.addi %0, %c2_i32 : i32
    %c0_i32 = arith.constant 0 : i32
    %c0_i32_0 = arith.constant 0 : i32
    %c0_i32_1 = arith.constant 0 : i32
    return %arg0, %1, %c0_i32, %c0_i32_0 : i32, i32, i32, i32
  }
  func.func @transform_3(%arg0: i32, %arg1: i32) -> (i32, i32, i32) {
    %c0_i32 = arith.constant 0 : i32
    %c0_i32_0 = arith.constant 0 : i32
    %c0_i32_1 = arith.constant 0 : i32
    %c0_i32_2 = arith.constant 0 : i32
    return %c0_i32, %c0_i32_0, %c0_i32_1 : i32, i32, i32
  }
  func.func @transform_4(%arg0: i32, %arg1: i32) -> (i32, i32) {
    %c0_i32 = arith.constant 0 : i32
    %c0_i32_0 = arith.constant 0 : i32
    %c0_i32_1 = arith.constant 0 : i32
    return %c0_i32, %c0_i32_0 : i32, i32
  }
  func.func @transform_5(%arg0: i32, %arg1: i32) -> (i32, i32, i32) {
    %c0_i32 = arith.constant 0 : i32
    %c0_i32_0 = arith.constant 0 : i32
    return %arg0, %c0_i32, %arg1 : i32, i32, i32
  }
  func.func @transform_6(%arg0: i32, %arg1: i32) -> (i32, i32, i32, i32) {
    %c0_i32 = arith.constant 0 : i32
    %c0_i32_0 = arith.constant 0 : i32
    %c0_i32_1 = arith.constant 0 : i32
    return %arg0, %arg1, %c0_i32, %c0_i32_0 : i32, i32, i32, i32
  }
}

</mosaic_0001>

<bundles_post_ra>
// kernel: tpu_custom_call.1
= control target key start
LH: loop header
LB: loop body
LE: loop exit
PB: predicated region body
PF: predicated region fallthrough
CT: control target
= control target key end

     0   :  { %s3656_s0 = inlined_call_operand.hbm [shape: bf16[2,10,8,150], index: 0, kind: input, shape index: {}]   ;;  %s3657_s1 = inlined_call_operand.hbm [shape: bf16[2,10,8,150], index: 1, kind: input, shape index: {}]   ;;  %s3658_s2 = inlined_call_operand.hbm [shape: bf16[2,10,8,150], index: 2, kind: input, shape index: {}]   ;;  %s3659_s3 = inlined_call_operand.vmem [shape: bf16[27,8,8], index: 3, kind: input, shape index: {}]   ;;  %s3660_s4 = inlined_call_operand.vmem [shape: f32[1,128], index: 4, kind: input, shape index: {}]   ;;  %s3661_s5 = inlined_call_operand.hbm [shape: bf16[2,8,1024], index: 5, kind: output, shape index: {0}]   ;;  %s3662_s6 = inlined_call_operand.vmem [shape: f32[2,8,8,2], index: 6, kind: output, shape index: {1}]  }
   0x1   :  { %3680 = sst [smem:[#allocation21_spill]] %s3656_s0 }
   0x2   :  { %3681 = sst [smem:[#allocation22_spill]] %s3657_s1 }
   0x3   :  { %3682 = sst [smem:[#allocation23_spill]] %s3658_s2 }
   0x4   :  { %3683 = sst [smem:[#allocation24_spill]] %s3659_s3 }
   0x5   :  { %3684 = sst [smem:[#allocation25_spill]] %s3660_s4 }
   0x6   :  { %3685 = sst [smem:[#allocation26_spill]] %s3661_s5 }
   0x7   :  { %3686 = sst [smem:[#allocation27_spill]] %s3662_s6 }
   0x8   :  { %12 = vsyncpa [#allocation3], 0 }
   0x9   :  { %14 = vsyncpa [#allocation3 + $0x1], 0 }
   0xa   :  { %15 = vsyncpa [#allocation6], 0 }
   0xb   :  { %17 = vsyncpa [#allocation6 + $0x1], 0 }
   0xc   :  { %18 = vsyncpa [#allocation4], 0 }
   0xd   :  { %20 = vsyncpa [#allocation4 + $0x1], 0  ;;  %s2936_s21 = smov 0   ;;  %s2938_s22 = smov 0  }
   0xe   :  { %s2940_s23 = smov 0   ;;  %s2942_s24 = smov 0  }
   0xf   :  { %s2944_s25 = smov 0   ;;  %s2946_s26 = smov 0  }
  0x10   :  { %s2948_s27 = smov 0   ;;  %s2950_s28 = smov 0  }
  0x11   :  { %s2952_s29 = smov 0   ;;  %s2954_s30 = smov 0  }
  0x12   :  { %s2956_s7 = smov 0   ;;  %s2958_s8 = smov 0  }
  0x13   :  { %s2960_s9 = smov 0   ;;  %s2962_s10 = smov 0  }
  0x14 LB: > { %3687 = sst [smem:[#allocation13_spill]] %s2849_s25  ;;  %s3007_s11 = sadd.s32 4294967295, %s2885_s10   ;;  %s2885_s10 = sphi %s2962_s10, %s26_s10   ;;  %s2881_s9 = sphi %s2960_s9, %s3739_s9   ;;  %s2877_s8 = sphi %s2958_s8, %s3751_s8   ;;  %s2873_s7 = sphi %s2956_s7, %s3750_s7   ;;  %s2869_s30 = sphi %s2954_s30, %s3749_s30   ;;  %s2865_s29 = sphi %s2952_s29, %s3748_s29   ;;  %s2861_s28 = sphi %s2950_s28, %s3747_s28   ;;  %s2857_s27 = sphi %s2948_s27, %s3746_s27   ;;  %s2853_s26 = sphi %s2946_s26, %s3745_s26   ;;  %s2849_s25 = sphi %s2944_s25, %s3744_s25   ;;  %s2845_s24 = sphi %s2942_s24, %s3743_s24   ;;  %s2841_s23 = sphi %s2940_s23, %s3742_s23   ;;  %s2837_s22 = sphi %s2938_s22, %s3741_s22   ;;  %s2833_s21 = sphi %s2936_s21, %s3740_s21  }
  0x15   : > { %3688 = sst [smem:[#allocation14_spill]] %s2869_s30  ;;  %s35_s12 = sadd.s32 1, %s2877_s8 }
  0x16   : > { %3689 = sst [smem:[#allocation15_spill]] %s2873_s7  ;;  %p36_p0 = scmp.ge.s32.totalorder %s35_s12, 8 }
  0x17   : > { %3690 = sst [smem:[#allocation16_spill]] %s2881_s9  ;;  %s38_s13 = sadd.s32 1, %s2881_s9 }
  0x18   : > { %p3674_p1 = scmp.eq.s32.totalorder %s2885_s10, 0  ;;  %p3673_p2 = scmp.eq.s32.totalorder %s3007_s11, 0 }
  0x19   : > { %s3013_s14 = scalar_select %p36_p0, 0, %s35_s12  }
  0x1a   : > { %s3753_s13 = smov (!%p36_p0, %s38_s13), %s2881_s9  ;;  %s77_s18 = sadd.s32 1, %s2853_s26 }
  0x1b   : > { %3691 = sst [smem:[#allocation17_spill]] %s3013_s14  ;;  %s43_s15 = ssub.s32 %s2877_s8, %s3013_s14 }
  0x1c   : > { %s71_s16 = sadd.s32 1, %s3013_s14  ;;  %p40_p3 = scmp.ge.s32.totalorder %s3753_s13, 2 }
  0x1d   : > { %s73_s17 = ssub.s32 %s35_s12, %s71_s16  ;;  %p84_p4 = scmp.ne.s32.totalorder %s2853_s26, %s2849_s25 }
  0x1e   : > { %s3755_s13 = smov (%p40_p3, %s3753_s13), 0  ;;  %p90_p6 = scmp.ne.s32.totalorder %s2849_s25, %s2845_s24 }
  0x1f   : > { %3692 = sst [smem:[#allocation18_spill]] %s3755_s13  ;;  %p3026_p5 = por %p84_p4, %p3674_p1 }
  0x20   : > { %s42_s20 = ssub.s32 %s2881_s9, %s3755_s13  ;;  %s100_s6 = sadd.s32 2, %s2877_s8 }
  0x21   : > { %s3035_s5 = sor.u32 %s43_s15, %s42_s20  ;;  %s74_s12 = sor.u32 %s73_s17, %s42_s20 }
  0x22   : > { %p75_p8 = scmp.eq.s32.totalorder %s74_s12, 0  ;;  %p3040_p9 = por %p90_p6, %p3673_p2 }
  0x23   : > { %s101_s4 = sadd.s32 2, %s3013_s14  ;;  %p3672_p10 = scmp.lt.s32.totalorder %s2885_s10, 16 }
  0x24   : > { %s3694_s16 = scalar_select %p3040_p9, 1, 0 }
  0x25   : > { %s3046_s30 = scalar_select %p75_p8, %s2853_s26, %s77_s18  }
  0x26   : > { %3695 = sst [smem:[#allocation19_spill]] %s3694_s16  ;;  %s103_s7 = ssub.s32 %s100_s6, %s101_s4 }
  0x27   : > { %3696 = sst [smem:[#allocation20_spill]] %s3046_s30  ;;  %s104_s24 = sor.u32 %s103_s7, %s42_s20 }
  0x28   : > { %p3049_p11 = scmp.eq.s32.totalorder %s104_s24, 0  ;;  %s2089_s17 = sshll.u32 %s2877_s8, 1 }
  0x29   : > { %s2486_s12 = smul.u32 20, %s2881_s9  ;;  %s269_s13 = sand.u32 1, %s2885_s10  }
  0x2a   : > { %s271_s3 = sand.u32 1, %s2853_s26   ;;  %s3698_s1 = sld [smem:[#allocation22_spill]] }
  0x2b   : > { %s258_s25 = sadd.s32 %s2486_s12, %s2089_s17  ;;  %s2091_s16 = sshll.u32 %s271_s3, 3 }
  0x2c   : > { %s3057_s14 = sshll.u32 %s258_s25, 6  ;;  %s273_s18 = scalar_lea.vmem [#allocation5], %s2091_s16 }
  0x2d   : > { %s284_s20 = sshll.u32 %s273_s18, 4  ;;  %p3071_p12 = pnand %p3672_p10, %p3026_p5  ;;  %s3065_s20 = int_to_ptr.vmem [resolvable:$true] %s284_s20 }
  0x2e   : > { %s3077_s25 = scalar_lea.sflag [#allocation6], %s269_s13 }
  0x2f   : > { %p2641_p4 = pneg %p3071_p12 }
  0x30   : > { %s1964_s7 = scalar_lea.hbm %s3698_s1, %s3057_s14  ;;  %s2644_s17 = scalar_lea.hbm %s3698_s1, 2560 }
  0x31   : > { %s3063_s30 = scalar_lea.hbm %s1964_s7, 128  ;;  %s2669_s16 = scalar_lea.hbm %s1964_s7, 256 }
  0x32   : > { %p2640_p3 = scmp.ne.s32.totalorder %s3063_s30, %s2669_s16  ;;  %p2645_p5 = scmp.lt.u32.totalorder %s3063_s30, %s3698_s1 }
  0x33   : > { %p2646_p10 = scmp.lt.u32.totalorder %s2644_s17, %s2669_s16  ;;  %p2648_p1 = scmp.lt.u32.totalorder %s2669_s16, %s3063_s30 }
  0x34   : > { %p2642_p6 = pnand %p2641_p4, %p2640_p3 }
  0x35   : > { %p2647_p2 = por %p2646_p10, %p2645_p5 }
  0x36   : > { %p2643_p8 = pneg %p2642_p6 }
  0x37   : > { %p2649_p7 = por %p2648_p1, %p2647_p2 }
  0x39   : > { %p2650_p13 = pnand %p2649_p7, %p2643_p8 }
  0x3b   : > { %2653 = shalt.err (!%p2650_p13)
}
  0x3c   : > { %s2654_s13 = scalar_lea.vmem %s3065_s20, 128  ;;  %s2887_s6 = smov [#allocation5]  }
  0x3d   : > { %p2655_p3 = scmp.ne.s32.totalorder %s3065_s20, %s2654_s13  ;;  %s2659_s7 = sshll.u32 %s2887_s6, 4  ;;  %s2660_s7 = int_to_ptr.vmem [resolvable:$false] %s2659_s7 }
  0x3e   : > { %s2661_s18 = scalar_lea.vmem %s2660_s7, 256  ;;  %p2662_p9 = scmp.lt.s32.totalorder %s3065_s20, %s2660_s7 }
  0x3f   : > { %p2657_p6 = pnand %p2655_p3, %p2641_p4  ;;  %p2663_p10 = scmp.lt.s32.totalorder %s2661_s18, %s2654_s13 }
  0x41   : > { %p2658_p0 = pneg %p2657_p6  ;;  %p2664_p5 = por %p2663_p10, %p2662_p9 }
  0x43   : > { %p2665_p1 = pnand %p2664_p5, %p2658_p0 }
  0x45   : > { %2668 = shalt.err (!%p2665_p1)
}
  0x46   : > { %2501 = dma.hbm_to_vmem [thread:$0]  (!%p3071_p12), %s3063_s30, 128, %s3065_s20, %s3077_s25  }
  0x47   : > { %p3700_p2 = scmp.lt.s32.totalorder %s2885_s10, 17  ;;  %p3701_p7 = scmp.ge.s32.totalorder %s2885_s10, 1 }
  0x48   : > { %s2085_s16 = sadd.s32 4294967294, %s2885_s10   ;;  %s47_s19 = sadd.s32 1, %s2865_s29 }
  0x49   : > { %p3108_p9 = pnand %p3701_p7, %p3700_p2  ;;  %p54_p13 = scmp.ne.s32.totalorder %s2865_s29, %s2861_s28 }
  0x4a   : > { %p3703_p0 = scmp.eq.s32.totalorder %s3035_s5, 0  ;;  %p3704_p4 = scmp.eq.s32.totalorder %s2885_s10, 0 }
  0x4b   : > { %s3702_s3 = scalar_select %p3108_p9, 1, 0 }
  0x4c   : > { %s3119_s24 = scalar_select %p3703_p0, %s2865_s29, %s47_s19  }
  0x4d   : > { %p56_p8 = por %p3704_p4, %p54_p13  ;;  %p60_p3 = scmp.ne.s32.totalorder %s2861_s28, %s2857_s27 }
  0x4e   : > { %p188_p6 = scmp.eq.s32.totalorder %s3007_s11, 15  ;;  %p194_p10 = scmp.eq.s32.totalorder %s2085_s16, 15 }
  0x4f   : > { %p3705_p5 = scmp.eq.s32.totalorder %s3007_s11, 0  ;;  %s248_s20 = sand.u32 1, %s2865_s29  }
  0x50   : > { %p3133_p1 = por %p188_p6, %p54_p13  ;;  %p3137_p2 = por %p194_p10, %p60_p3 }
  0x51   : > { %p3128_p12 = por %p3705_p5, %p60_p3  ;;  %s2088_s5 = sshll.u32 %s248_s20, 3 }
  0x52   : > { %s3707_s17 = scalar_select %p3133_p1, 1, 0 }
  0x53   : > { %s3706_s30 = scalar_select %p3128_p12, 1, 0 }
  0x54   : > { %s3708_s12 = scalar_select %p3137_p2, 1, 0 }
  0x55   : > { %s3709_s0 = sld [smem:[#allocation21_spill]]  ;;  %s252_s7 = scalar_lea.vmem [#allocation2], %s2088_s5 }
  0x56   : > { %s262_s18 = sshll.u32 %s252_s7, 4  ;;  %p3710_p7 = scmp.lt.s32.totalorder %s2885_s10, 16  ;;  %s3153_s18 = int_to_ptr.vmem [resolvable:$true] %s262_s18 }
  0x57   : > { %s249_s19 = scalar_lea.sflag [#allocation3], %s248_s20 }
  0x58   : > { %p3149_p13 = pnand %p3710_p7, %p56_p8 }
  0x5a   : > { %p2672_p4 = pneg %p3149_p13 }
  0x5b   : > { %s3145_s6 = scalar_lea.hbm %s3709_s0, %s3057_s14  ;;  %s2675_s13 = scalar_lea.hbm %s3709_s0, 2560 }
  0x5c   : > { %s2670_s1 = scalar_lea.hbm %s3145_s6, 128  ;;  %p2676_p8 = scmp.lt.u32.totalorder %s3145_s6, %s3709_s0 }
  0x5d   : > { %p2671_p0 = scmp.ne.s32.totalorder %s3145_s6, %s2670_s1  ;;  %p2677_p10 = scmp.lt.u32.totalorder %s2675_s13, %s2670_s1 }
  0x5e   : > { %p2679_p7 = scmp.lt.u32.totalorder %s2670_s1, %s3145_s6 }
  0x5f   : > { %p2673_p3 = pnand %p2672_p4, %p2671_p0  ;;  %p2678_p5 = por %p2677_p10, %p2676_p8 }
  0x61   : > { %p2674_p6 = pneg %p2673_p3  ;;  %p2680_p2 = por %p2679_p7, %p2678_p5 }
  0x63   : > { %p2681_p1 = pnand %p2680_p2, %p2674_p6 }
  0x65   : > { %2684 = shalt.err (!%p2681_p1)
}
  0x66   : > { %s2685_s20 = scalar_lea.vmem %s3153_s18, 128  ;;  %s2888_s5 = smov [#allocation2]  }
  0x67   : > { %p2686_p0 = scmp.ne.s32.totalorder %s3153_s18, %s2685_s20  ;;  %s2690_s4 = sshll.u32 %s2888_s5, 4  ;;  %s2691_s4 = int_to_ptr.vmem [resolvable:$false] %s2690_s4 }
  0x68   : > { %s2692_s9 = scalar_lea.vmem %s2691_s4, 256  ;;  %p2693_p9 = scmp.lt.s32.totalorder %s3153_s18, %s2691_s4 }
  0x69   : > { %p2688_p3 = pnand %p2686_p0, %p2672_p4  ;;  %p2694_p8 = scmp.lt.s32.totalorder %s2692_s9, %s2685_s20 }
  0x6b   : > { %p2689_p12 = pneg %p2688_p3  ;;  %p2695_p10 = por %p2694_p8, %p2693_p9 }
  0x6d   : > { %p2696_p5 = pnand %p2695_p10, %p2689_p12 }
  0x6f   : > { %2699 = shalt.err (!%p2696_p5)
}
  0x70   : > { %2498 = dma.hbm_to_vmem [thread:$0]  (!%p3149_p13), %s3145_s6, 128, %s3153_s18, %s249_s19  }
  0x71   : > { %s107_s1 = sadd.s32 1, %s2841_s23  ;;  %p114_p9 = scmp.ne.s32.totalorder %s2841_s23, %s2837_s22 }
  0x72   : > { %s3186_s13 = scalar_select %p3049_p11, %s2841_s23, %s107_s1  }
  0x73   : > { %p3712_p12 = scmp.eq.s32.totalorder %s2885_s10, 0  ;;  %p120_p2 = scmp.ne.s32.totalorder %s2837_s22, %s2833_s21 }
  0x74   : > { %s293_s16 = sand.u32 1, %s2841_s23   ;;  %s3713_s2 = sld [smem:[#allocation23_spill]] }
  0x75   : > { %p116_p1 = por %p114_p9, %p3712_p12  ;;  %p3714_p4 = scmp.eq.s32.totalorder %s3007_s11, 0 }
  0x76   : > { %s2094_s9 = sshll.u32 %s293_s16, 3  ;;  %p3716_p11 = scmp.lt.s32.totalorder %s2885_s10, 16 }
  0x77   : > { %p3199_p6 = por %p120_p2, %p3714_p4  ;;  %s295_s15 = scalar_lea.vmem [#allocation7], %s2094_s9 }
  0x78   : > { %s306_s18 = sshll.u32 %s295_s15, 4  ;;  %p3207_p13 = pnand %p3716_p11, %p116_p1  ;;  %s307_s18 = int_to_ptr.vmem [resolvable:$true] %s306_s18 }
  0x79   : > { %s3715_s4 = scalar_select %p3199_p6, 1, 0 }
  0x7a   : > { %s1973_s5 = scalar_lea.hbm %s3713_s2, %s3057_s14  ;;  %p2702_p0 = pneg %p3207_p13 }
  0x7b   : > { %s3203_s6 = scalar_lea.hbm %s1973_s5, 256  ;;  %s2730_s14 = scalar_lea.hbm %s1973_s5, 384 }
  0x7c   : > { %p2701_p7 = scmp.ne.s32.totalorder %s3203_s6, %s2730_s14  ;;  %s2705_s16 = scalar_lea.hbm %s3713_s2, 2560 }
  0x7d   : > { %p2706_p10 = scmp.lt.u32.totalorder %s3203_s6, %s3713_s2  ;;  %p2707_p5 = scmp.lt.u32.totalorder %s2705_s16, %s2730_s14 }
  0x7e   : > { %p2703_p3 = pnand %p2702_p0, %p2701_p7  ;;  %p2709_p12 = scmp.lt.u32.totalorder %s2730_s14, %s3203_s6 }
  0x7f   : > { %p2708_p9 = por %p2707_p5, %p2706_p10 }
  0x80   : > { %p2704_p8 = pneg %p2703_p3 }
  0x81   : > { %p2710_p1 = por %p2709_p12, %p2708_p9 }
  0x83   : > { %p2711_p2 = pnand %p2710_p1, %p2704_p8 }
  0x85   : > { %2714 = shalt.err (!%p2711_p2)
}
  0x86   : > { %s2715_s5 = scalar_lea.vmem %s307_s18, 128  ;;  %s2889_s9 = smov [#allocation7]  }
  0x87   : > { %p2716_p4 = scmp.ne.s32.totalorder %s307_s18, %s2715_s5  ;;  %s2720_s15 = sshll.u32 %s2889_s9, 4  ;;  %s2721_s15 = int_to_ptr.vmem [resolvable:$false] %s2720_s15 }
  0x88   : > { %s2722_s19 = scalar_lea.vmem %s2721_s15, 256  ;;  %p2723_p3 = scmp.lt.s32.totalorder %s307_s18, %s2721_s15 }
  0x89   : > { %p2718_p11 = pnand %p2716_p4, %p2702_p0  ;;  %p2724_p6 = scmp.lt.s32.totalorder %s2722_s19, %s2715_s5 }
  0x8b   : > { %p2719_p7 = pneg %p2718_p11  ;;  %p2725_p5 = por %p2724_p6, %p2723_p3 }
  0x8d   : > { %p2726_p10 = pnand %p2725_p5, %p2719_p7 }
  0x8f   : > { %2729 = shalt.err (!%p2726_p10)
}
  0x90   : > { %2504 = dma.hbm_to_vmem [thread:$0]  (!%p3207_p13), %s3203_s6, 128, %s307_s18, %s3077_s25  }
  0x91   : > { %p3718_p8 = scmp.ne.s32.totalorder %s3702_s3, 0 }
  0x92   : > { %s3235_s14 = sand.u32 (!%p3718_p8), 1, %s2861_s28   ;;  %p3719_p6 = scmp.ne.s32.totalorder (!%p3718_p8), %s3706_s30, 0 }
  0x93   : > { %315 = sbr.rel (%p3718_p8) target bundleno = 814 (0x32e), region = 40  ;;  %s2098_s1 = sshll.u32 (!%p3718_p8), %s3235_s14, 3 }
  0x94   : > { %s318_s16 = scalar_lea.sflag (!%p3718_p8), [#allocation3], %s3235_s14  ;;  %s321_s7 = scalar_lea.vmem (!%p3718_p8), [#allocation2], %s2098_s1 }
  0x9a   : > { %2816 = dma.done.wait (%p3719_p6), %s318_s16, 128  }
  0x9b   : > { %2818 = vsyncadd (%p3719_p6), %s318_s16, 4294967168  ;;  %s3720_s21 = sld [smem:[#allocation13_spill]]  ;;  %s3721_s25 = sld [smem:[#allocation19_spill]] }
  0x9c   : > { %s326_s6 = sand.u32 1, %s3007_s11  }
  0x9d   : > { %s327_s20 = scalar_lea.sflag [#allocation6], %s326_s6 }
  0xa1   : > { %s328_s3 = sand.u32 1, %s3720_s21   ;;  %p3722_p13 = scmp.ne.s32.totalorder %s3721_s25, 0 }
  0xa2   : > { %s2099_s18 = sshll.u32 %s328_s3, 3 }
  0xa3   : > { %s330_s5 = scalar_lea.vmem [#allocation5], %s2099_s18 }
  0xa4   : > { %2820 = dma.done.wait (%p3722_p13), %s327_s20, 128  }
  0xa5   : > { %2822 = vsyncadd (%p3722_p13), %s327_s20, 4294967168  ;;  %s337_s9 = sand.u32 1, %s2837_s22   ;;  %p3723_p0 = scmp.ne.s32.totalorder %s3715_s4, 0 }
  0xa6   : > { %s3250_s15 = sshll.u32 %s337_s9, 3 }
  0xa7   : > { %s339_s30 = scalar_lea.vmem [#allocation7], %s3250_s15 }
  0xa8   : > { %2824 = dma.done.wait (%p3723_p0), %s327_s20, 128  }
  0xa9   : > { %2826 = vsyncadd (%p3723_p0), %s327_s20, 4294967168  ;;  %v2890_v0 = vmov 0.0   ;;  %vm2891_vm0 = vmmov 0   ;;  %v3263_v1 = vld [vmem:[%s330_s5] sm:$0xff]  ;;  %v3265_v2 = vld [vmem:[%s321_s7] sm:$0xff]  ;;  %s2892_s11 = smov 117  }
  0xaa   : > { %2223 = vmatprep.subr.bf16.mxu1 %v2890_v0  ;;  %2301 = vmatprep.subr.bf16.mxu0 %v2890_v0  ;;  %v2126_v3 = vcombine.low %v3263_v1, %v3263_v1  ;;  %v2105_v4 = vcombine.low %v3265_v2, %v3265_v2  ;;  %s2893_s4 = smov 127   ;;  %v2127_v5 = vcombine.high %v3263_v1, %v3263_v1  ;;  %s2894_s19 = smov 116   ;;  %v3295_v7 = vld [vmem:[%s339_s30] sm:$0xff]  ;;  %vm410_vm1 = vcmask 1039360  }
  0xab   : > { %2225 = vmatprep.mubr.msk.bf16.mxu1 %vm2891_vm0, %v2890_v0  ;;  %2303 = vmatprep.mubr.msk.bf16.mxu0 %vm2891_vm0, %v2890_v0  ;;  %v2106_v6 = vcombine.high %v3265_v2, %v3265_v2  ;;  %s2895_s1 = smov 108   ;;  %s2896_s16 = smov 126   ;;  %v2146_v8 = vcombine.low %v3295_v7, %v3295_v7  ;;  %v2147_v9 = vcombine.high %v3295_v7, %v3295_v7  ;;  %vm622_vm2 = vcmask 957440  }
  0xac   : > { %1110 = vrot.lane.b32.xlu0 %v2126_v3, %s2892_s11  ;;  %406 = vrot.lane.b32.xlu1 %v2105_v4, %s2893_s4  ;;  %s2897_s7 = smov 107   ;;  %s2898_s21 = smov 118   ;;  %vm416_vm3 = vcmask 1043456   ;;  %vm677_vm4 = vcmask 949248   ;;  %vm412_vm5 = vcmask 64512   ;;  %vm732_vm6 = vcmask 883712  }
  0xad   : > { %s2899_s25 = smov 106   ;;  %s3724_s18 = sld [smem:[#allocation24_spill]]  ;;  %v464_v22 = vsel %vm416_vm3, %v3265_v2, 0  ;;  %vm512_vm7 = vcmask 1031168   ;;  %vm787_vm8 = vcmask 875520   ;;  %vm567_vm9 = vcmask 965632  }
  0xae   : > { %vm842_vm10 = vcmask 867328   ;;  %v1385_v60 = vsel %vm416_vm3, %v3295_v7, 0  ;;  %s3728_s30 = sld [smem:[#allocation26_spill]]  ;;  %p3730_p12 = scmp.ne.s32.totalorder %s3707_s17, 0 }
  0xaf   : > { %s2900_s0 = smov [#allocation8]  }
  0xb0   : > { %1112 = vrot.lane.b32.xlu0 %v2127_v5, %s2892_s11  ;;  %408 = vrot.lane.b32.xlu1 %v2106_v6, %s2893_s4 }
  0xb3   : > { %v2133_v18 = vld [vmem:[%s3724_s18 + $0x34] sm:$0xf]  ;;  %v2104_v19 = vld [vmem:[%s3724_s18 + $0x4] sm:$0xf]  ;;  %v398_v31 = vld [vmem:[%s3724_s18] sm:$0xf] }
  0xb4   : > { %1164 = vrot.lane.b32.xlu0 %v2126_v3, %s2894_s19  ;;  %1166 = vrot.lane.b32.xlu1 %v2127_v5, %s2894_s19  ;;  %v2135_v32 = vld [vmem:[%s3724_s18 + $0x38] sm:$0xf]  ;;  %v2109_v41 = vld [vmem:[%s3724_s18 + $0x8] sm:$0xf] }
  0xb5   : > { %v2137_v42 = vld [vmem:[%s3724_s18 + $0x3c] sm:$0xf]  ;;  %v2111_v51 = vld [vmem:[%s3724_s18 + $0xc] sm:$0xf]  ;;  %v2139_v52 = vld [vmem:[%s3724_s18 + $0x40] sm:$0xf] }
  0xb6   : > { %v2113_v58 = vld [vmem:[%s3724_s18 + $0x10] sm:$0xf]  ;;  %v2141_v59 = vld [vmem:[%s3724_s18 + $0x44] sm:$0xf]  ;;  %v2143_v7 = vld [vmem:[%s3724_s18 + $0x48] sm:$0xf] }
  0xb8   : > { %1218 = vrot.lane.b32.xlu0 %v2126_v3, %s2895_s1  ;;  %1220 = vrot.lane.b32.xlu1 %v2127_v5, %s2895_s1 }
  0xbc   : > { %508 = vrot.lane.b32.xlu0 %v2105_v4, %s2896_s16  ;;  %510 = vrot.lane.b32.xlu1 %v2106_v6, %s2896_s16 }
  0xc0   : > { %1272 = vrot.lane.b32.xlu0 %v2126_v3, %s2897_s7  ;;  %1274 = vrot.lane.b32.xlu1 %v2127_v5, %s2897_s7 }
  0xc4   : > { %563 = vrot.lane.b32.xlu0 %v2105_v4, %s2898_s21  ;;  %565 = vrot.lane.b32.xlu1 %v2106_v6, %s2898_s21 }
  0xc8   : > { %1326 = vrot.lane.b32.xlu0 %v2126_v3, %s2899_s25  ;;  %1328 = vrot.lane.b32.xlu1 %v2127_v5, %s2899_s25 }
  0xcc   : > { %618 = vrot.lane.b32.xlu0 %v2105_v4, %s2892_s11  ;;  %620 = vrot.lane.b32.xlu1 %v2106_v6, %s2892_s11 }
  0xd0   : > { %673 = vrot.lane.b32.xlu0 %v2105_v4, %s2894_s19  ;;  %675 = vrot.lane.b32.xlu1 %v2106_v6, %s2894_s19 }
  0xd4   : > { %1435 = vrot.lane.b32.xlu0 %v2146_v8, %s2893_s4  ;;  %1437 = vrot.lane.b32.xlu1 %v2147_v9, %s2893_s4 }
  0xd8   : > { %728 = vrot.lane.b32.xlu0 %v2105_v4, %s2895_s1  ;;  %730 = vrot.lane.b32.xlu1 %v2106_v6, %s2895_s1 }
  0xdc   : > { %1489 = vrot.lane.b32.xlu0 %v2146_v8, %s2896_s16  ;;  %1491 = vrot.lane.b32.xlu1 %v2147_v9, %s2896_s16 }
  0xe0   : > { %783 = vrot.lane.b32.xlu0 %v2105_v4, %s2897_s7  ;;  %785 = vrot.lane.b32.xlu1 %v2106_v6, %s2897_s7 }
  0xe4   : > { %1543 = vrot.lane.b32.xlu0 %v2146_v8, %s2898_s21  ;;  %1545 = vrot.lane.b32.xlu1 %v2147_v9, %s2898_s21 }
  0xe8   : > { %838 = vrot.lane.b32.xlu0 %v2105_v4, %s2899_s25  ;;  %840 = vrot.lane.b32.xlu1 %v2106_v6, %s2899_s25  ;;  %v2115_v6 = vld [vmem:[%s3724_s18 + $0x14] sm:$0xf] }
  0xec   : > { %1597 = vrot.lane.b32.xlu0 %v2146_v8, %s2892_s11  ;;  %1599 = vrot.lane.b32.xlu1 %v2147_v9, %s2892_s11  ;;  %s3729_s11 = smov %s3728_s30 }
  0xf0   : > { %1651 = vrot.lane.b32.xlu0 %v2146_v8, %s2894_s19  ;;  %1653 = vrot.lane.b32.xlu1 %v2147_v9, %s2894_s19  ;;  %s3725_s19 = sld [smem:[#allocation15_spill]] }
  0xf4   : > { %948 = vrot.lane.b32.xlu0 %v2126_v3, %s2893_s4  ;;  %950 = vrot.lane.b32.xlu1 %v2127_v5, %s2893_s4 }
  0xf6   : > { %s2165_s3 = sshll.u32 %s3725_s19, 3 }
  0xf8   : > { %1705 = vrot.lane.b32.xlu0 %v2146_v8, %s2895_s1  ;;  %1707 = vrot.lane.b32.xlu1 %v2147_v9, %s2895_s1  ;;  %s3726_s1 = sld [smem:[#allocation14_spill]] }
  0xfc   : > { %1002 = vrot.lane.b32.xlu0 %v2126_v3, %s2896_s16  ;;  %1004 = vrot.lane.b32.xlu1 %v2127_v5, %s2896_s16  ;;  %s2101_s16 = sshll.u32 %s3235_s14, 2 }
  0xfd   : > { %s375_s6 = scalar_lea.vmem [#allocation8], %s2101_s16  ;;  %s2735_s16 = sshll.u32 %s2900_s0, 4  ;;  %s2736_s16 = int_to_ptr.vmem [resolvable:$false] %s2735_s16 }
  0xfe   : > { %s1904_s20 = sadd.s32 %s3726_s1, %s2165_s3  ;;  %s2737_s2 = scalar_lea.vmem %s2736_s16, 128 }
  0xff   : > { %s2166_s5 = sshll.u32 %s1904_s20, 6 }
 0x100   : > { %1759 = vrot.lane.b32.xlu0 %v2146_v8, %s2897_s7  ;;  %1761 = vrot.lane.b32.xlu1 %v2147_v9, %s2897_s7  ;;  %s3577_s4 = scalar_lea.hbm %s3728_s30, %s2166_s5  ;;  %s1908_s7 = sshll.u32 %s375_s6, 4  ;;  %s1909_s7 = int_to_ptr.vmem [resolvable:$true] %s1908_s7 }
 0x101   : > { %p2738_p4 = scmp.lt.s32.totalorder %s1909_s7, %s2736_s16 }
 0x104   : > { %1056 = vrot.lane.b32.xlu0 %v2126_v3, %s2898_s21  ;;  %1058 = vrot.lane.b32.xlu1 %v2127_v5, %s2898_s21  ;;  %s1885_s21 = scalar_lea.sflag [#allocation4], %s3235_s14 }
 0x108   : > { %1813 = vrot.lane.b32.xlu0 %v2146_v8, %s2899_s25  ;;  %1815 = vrot.lane.b32.xlu1 %v2147_v9, %s2899_s25  ;;  %s3727_s25 = sld [smem:[#allocation25_spill]] }
 0x11e   : > { %v1111_v10 = vpop.permute.xlu0 %1110  ;;  %v407_v11 = vpop.permute.xlu1 %406 }
 0x122   : > { %v1113_v12 = vpop.permute.xlu0 %1112  ;;  %v409_v13 = vpop.permute.xlu1 %408 }
 0x123   : > { %v411_v14 = vsel %vm410_vm1, %v407_v11, %v409_v13  ;;  %v1114_v15 = vsel %vm622_vm2, %v1111_v10, %v1113_v12 }
 0x124   : > { %v418_v16 = vsel %vm416_vm3, %v411_v14, 0  ;;  %v1119_v17 = vsel %vm416_vm3, %v1114_v15, 0 }
 0x125   : > { %2224 = vmatpush3.bf16.msra.mxu1 %v418_v16  ;;  %2302 = vmatpush3.bf16.msra.mxu0 %v1119_v17  ;;  %v2117_v16 = vld [vmem:[%s3724_s18 + $0x18] sm:$0xf]  ;;  %v2145_v17 = vld [vmem:[%s3724_s18 + $0x4c] sm:$0xf] }
 0x126   : > { %v1165_v20 = vpop.permute.xlu0 %1164  ;;  %v1167_v21 = vpop.permute.xlu1 %1166  ;;  %2307 = vmatprep.subr.bf16.mxu0 %v2890_v0  ;;  %2229 = vmatprep.subr.bf16.mxu1 %v2890_v0 }
 0x127   : > { %v1168_v23 = vsel %vm677_vm4, %v1165_v20, %v1167_v21 }
 0x128   : > { %v1173_v24 = vsel %vm416_vm3, %v1168_v23, 0  ;;  %2304 = vmatmul.mubr.msk.bf16.vlgmr.msra.gmra.mrb[0].mxu0 %vm412_vm5, %v2133_v18  ;;  %2226 = vmatmul.mubr.msk.bf16.vlgmr.msra.gmra.mrb[0].mxu1 %vm412_vm5, %v2104_v19 }
 0x129   : > { %2308 = vmatpush3.bf16.msra.mxu0 %v1173_v24  ;;  %2230 = vmatpush3.bf16.msra.mxu1 %v464_v22 }
 0x12a   : > { %v1219_v25 = vpop.permute.xlu0 %1218  ;;  %v1221_v26 = vpop.permute.xlu1 %1220  ;;  %2231 = vmatprep.mubr.msk.bf16.mxu1 %vm2891_vm0, %v2890_v0  ;;  %2309 = vmatprep.mubr.msk.bf16.mxu0 %vm2891_vm0, %v2890_v0 }
 0x12b   : > { %2313 = vmatprep.subr.bf16.mxu0 %v2890_v0  ;;  %2235 = vmatprep.subr.bf16.mxu1 %v2890_v0  ;;  %v1222_v29 = vsel %vm732_vm6, %v1219_v25, %v1221_v26  ;;  %v2119_v26 = vld [vmem:[%s3724_s18 + $0x1c] sm:$0xf] }
 0x12c   : > { %v1227_v33 = vsel %vm416_vm3, %v1222_v29, 0 }
 0x12e   : > { %v509_v27 = vpop.permute.xlu0 %508  ;;  %v511_v28 = vpop.permute.xlu1 %510 }
 0x12f   : > { %v513_v30 = vsel %vm512_vm7, %v509_v27, %v511_v28  ;;  %v2149_v27 = vld [vmem:[%s3724_s18 + $0x50] sm:$0xf] }
 0x130   : > { %v518_v34 = vsel %vm416_vm3, %v513_v30, 0 }
 0x132   : > { %v1273_v35 = vpop.permute.xlu0 %1272  ;;  %v1275_v36 = vpop.permute.xlu1 %1274 }
 0x133   : > { %v1276_v39 = vsel %vm787_vm8, %v1273_v35, %v1275_v36  ;;  %v898_v36 = vsel %vm416_vm3, %v3263_v1, 0 }
 0x134   : > { %2232 = vmatmul.mubr.msk.bf16.vlgmr.msra.gmra.mrb[0].mxu1 %vm412_vm5, %v398_v31  ;;  %2310 = vmatmul.mubr.msk.bf16.vlgmr.msra.gmra.mrb[0].mxu0 %vm412_vm5, %v2135_v32  ;;  %v1281_v43 = vsel %vm416_vm3, %v1276_v39, 0 }
 0x135   : > { %2314 = vmatpush3.bf16.msra.mxu0 %v1227_v33  ;;  %2236 = vmatpush3.bf16.msra.mxu1 %v518_v34  ;;  %v2121_v33 = vld [vmem:[%s3724_s18 + $0x20] sm:$0xf]  ;;  %v2151_v34 = vld [vmem:[%s3724_s18 + $0x54] sm:$0xf] }
 0x136   : > { %2237 = vmatprep.mubr.msk.bf16.mxu1 %vm2891_vm0, %v2890_v0  ;;  %2315 = vmatprep.mubr.msk.bf16.mxu0 %vm2891_vm0, %v2890_v0  ;;  %v564_v37 = vpop.permute.xlu0 %563  ;;  %v566_v38 = vpop.permute.xlu1 %565 }
 0x137   : > { %2319 = vmatprep.subr.bf16.mxu0 %v2890_v0  ;;  %2241 = vmatprep.subr.bf16.mxu1 %v2890_v0  ;;  %v568_v40 = vsel %vm567_vm9, %v564_v37, %v566_v38 }
 0x138   : > { %v573_v44 = vsel %vm416_vm3, %v568_v40, 0 }
 0x13a   : > { %v1327_v45 = vpop.permute.xlu0 %1326  ;;  %v1329_v46 = vpop.permute.xlu1 %1328 }
 0x13b   : > { %v1330_v49 = vsel %vm842_vm10, %v1327_v45, %v1329_v46 }
 0x13c   : > { %v1335_v53 = vsel %vm416_vm3, %v1330_v49, 0 }
 0x13e   : > { %v619_v47 = vpop.permute.xlu0 %618  ;;  %v621_v48 = vpop.permute.xlu1 %620 }
 0x13f   : > { %v623_v50 = vsel %vm622_vm2, %v619_v47, %v621_v48 }
 0x140   : > { %2238 = vmatmul.mubr.msk.bf16.vlgmr.msra.gmra.mrb[0].mxu1 %vm412_vm5, %v2109_v41  ;;  %2316 = vmatmul.mubr.msk.bf16.vlgmr.msra.gmra.mrb[0].mxu0 %vm412_vm5, %v2137_v42  ;;  %v628_v54 = vsel %vm416_vm3, %v623_v50, 0  ;;  %v2123_v42 = vld [vmem:[%s3724_s18 + $0x24] sm:$0xf] }
 0x141   : > { %2320 = vmatpush3.bf16.msra.mxu0 %v1281_v43  ;;  %2242 = vmatpush3.bf16.msra.mxu1 %v573_v44  ;;  %v2153_v43 = vld [vmem:[%s3724_s18 + $0x58] sm:$0xf] }
 0x142   : > { %2243 = vmatprep.mubr.msk.bf16.mxu1 %vm2891_vm0, %v2890_v0  ;;  %2321 = vmatprep.mubr.msk.bf16.mxu0 %vm2891_vm0, %v2890_v0  ;;  %v674_v55 = vpop.permute.xlu0 %673  ;;  %v676_v56 = vpop.permute.xlu1 %675 }
 0x143   : > { %2325 = vmatprep.subr.bf16.mxu0 %v2890_v0  ;;  %2247 = vmatprep.subr.bf16.mxu1 %v2890_v0  ;;  %v678_v57 = vsel %vm677_vm4, %v674_v55, %v676_v56 }
 0x144   : > { %v683_v61 = vsel %vm416_vm3, %v678_v57, 0 }
 0x146   : > { %v1436_v62 = vpop.permute.xlu0 %1435  ;;  %v1438_v63 = vpop.permute.xlu1 %1437 }
 0x147   : > { %v1439_v4 = vsel %vm410_vm1, %v1436_v62, %v1438_v63  ;;  %v2129_v62 = vld [vmem:[%s3724_s18 + $0x2c] sm:$0xf]  ;;  %v2157_v63 = vld [vmem:[%s3724_s18 + $0x60] sm:$0xf] }
 0x148   : > { %v1444_v8 = vsel %vm416_vm3, %v1439_v4, 0 }
 0x14a   : > { %v729_v2 = vpop.permute.xlu0 %728  ;;  %v731_v3 = vpop.permute.xlu1 %730 }
 0x14b   : > { %v733_v5 = vsel %vm732_vm6, %v729_v2, %v731_v3 }
 0x14c   : > { %2244 = vmatmul.mubr.msk.bf16.vlgmr.msra.gmra.mrb[0].mxu1 %vm412_vm5, %v2111_v51  ;;  %2322 = vmatmul.mubr.msk.bf16.vlgmr.msra.gmra.mrb[0].mxu0 %vm412_vm5, %v2139_v52  ;;  %v738_v9 = vsel %vm416_vm3, %v733_v5, 0  ;;  %v2125_v52 = vld [vmem:[%s3724_s18 + $0x28] sm:$0xf] }
 0x14d   : > { %2326 = vmatpush3.bf16.msra.mxu0 %v1335_v53  ;;  %2248 = vmatpush3.bf16.msra.mxu1 %v628_v54  ;;  %v2155_v53 = vld [vmem:[%s3724_s18 + $0x5c] sm:$0xf] }
 0x14e   : > { %2249 = vmatprep.mubr.msk.bf16.mxu1 %vm2891_vm0, %v2890_v0  ;;  %2327 = vmatprep.mubr.msk.bf16.mxu0 %vm2891_vm0, %v2890_v0  ;;  %v1490_v10 = vpop.permute.xlu0 %1489  ;;  %v1492_v11 = vpop.permute.xlu1 %1491 }
 0x14f   : > { %2331 = vmatprep.subr.bf16.mxu0 %v2890_v0  ;;  %2253 = vmatprep.subr.bf16.mxu1 %v2890_v0  ;;  %v1493_v14 = vsel %vm512_vm7, %v1490_v10, %v1492_v11  ;;  %v2161_v10 = vld [vmem:[%s3724_s18 + $0x68] sm:$0xf] }
 0x150   : > { %v1498_v18 = vsel %vm416_vm3, %v1493_v14, 0 }
 0x152   : > { %v784_v12 = vpop.permute.xlu0 %783  ;;  %v786_v13 = vpop.permute.xlu1 %785 }
 0x153   : > { %v788_v15 = vsel %vm787_vm8, %v784_v12, %v786_v13 }
 0x154   : > { %v793_v19 = vsel %vm416_vm3, %v788_v15, 0 }
 0x156   : > { %v1544_v20 = vpop.permute.xlu0 %1543  ;;  %v1546_v21 = vpop.permute.xlu1 %1545 }
 0x157   : > { %v1547_v24 = vsel %vm567_vm9, %v1544_v20, %v1546_v21 }
 0x158   : > { %2250 = vmatmul.mubr.msk.bf16.vlgmr.msra.gmra.mrb[0].mxu1 %vm412_vm5, %v2113_v58  ;;  %2328 = vmatmul.mubr.msk.bf16.vlgmr.msra.gmra.mrb[0].mxu0 %vm412_vm5, %v2141_v59  ;;  %v1552_v28 = vsel %vm416_vm3, %v1547_v24, 0 }
 0x159   : > { %2332 = vmatpush3.bf16.msra.mxu0 %v1385_v60  ;;  %2254 = vmatpush3.bf16.msra.mxu1 %v683_v61 }
 0x15a   : > { %2255 = vmatprep.mubr.msk.bf16.mxu1 %vm2891_vm0, %v2890_v0  ;;  %2333 = vmatprep.mubr.msk.bf16.mxu0 %vm2891_vm0, %v2890_v0  ;;  %v839_v22 = vpop.permute.xlu0 %838  ;;  %v841_v23 = vpop.permute.xlu1 %840 }
 0x15b   : > { %2337 = vmatprep.subr.bf16.mxu0 %v2890_v0  ;;  %2259 = vmatprep.subr.bf16.mxu1 %v2890_v0  ;;  %v843_v25 = vsel %vm842_vm10, %v839_v22, %v841_v23 }
 0x15c   : > { %v848_v29 = vsel %vm416_vm3, %v843_v25, 0 }
 0x15e   : > { %v1598_v30 = vpop.permute.xlu0 %1597  ;;  %v1600_v31 = vpop.permute.xlu1 %1599 }
 0x15f   : > { %v1601_v32 = vsel %vm622_vm2, %v1598_v30, %v1600_v31 }
 0x160   : > { %v1606_v35 = vsel %vm416_vm3, %v1601_v32, 0 }
 0x162   : > { %v1652_v37 = vpop.permute.xlu0 %1651  ;;  %v1654_v38 = vpop.permute.xlu1 %1653 }
 0x163   : > { %v1655_v40 = vsel %vm677_vm4, %v1652_v37, %v1654_v38 }
 0x164   : > { %2256 = vmatmul.mubr.msk.bf16.vlgmr.msra.gmra.mrb[0].mxu1 %vm412_vm5, %v2115_v6  ;;  %2334 = vmatmul.mubr.msk.bf16.vlgmr.msra.gmra.mrb[0].mxu0 %vm412_vm5, %v2143_v7  ;;  %v1660_v44 = vsel %vm416_vm3, %v1655_v40, 0  ;;  %v2131_v7 = vld [vmem:[%s3724_s18 + $0x30] sm:$0xf] }
 0x165   : > { %2338 = vmatpush3.bf16.msra.mxu0 %v1444_v8  ;;  %2260 = vmatpush3.bf16.msra.mxu1 %v738_v9  ;;  %v2159_v8 = vld [vmem:[%s3724_s18 + $0x64] sm:$0xf] }
 0x166   : > { %2261 = vmatprep.mubr.msk.bf16.mxu1 %vm2891_vm0, %v2890_v0  ;;  %2339 = vmatprep.mubr.msk.bf16.mxu0 %vm2891_vm0, %v2890_v0  ;;  %v949_v39 = vpop.permute.xlu0 %948  ;;  %v951_v1 = vpop.permute.xlu1 %950 }
 0x167   : > { %2343 = vmatprep.subr.bf16.mxu0 %v2890_v0  ;;  %2265 = vmatprep.subr.bf16.mxu1 %v2890_v0  ;;  %v952_v41 = vsel %vm410_vm1, %v949_v39, %v951_v1 }
 0x168   : > { %v957_v45 = vsel %vm416_vm3, %v952_v41, 0 }
 0x16a   : > { %v1706_v46 = vpop.permute.xlu0 %1705  ;;  %v1708_v47 = vpop.permute.xlu1 %1707 }
 0x16b   : > { %v1709_v50 = vsel %vm732_vm6, %v1706_v46, %v1708_v47 }
 0x16c   : > { %v1714_v54 = vsel %vm416_vm3, %v1709_v50, 0 }
 0x16e   : > { %v1003_v48 = vpop.permute.xlu0 %1002  ;;  %v1005_v49 = vpop.permute.xlu1 %1004 }
 0x16f   : > { %v1006_v51 = vsel %vm512_vm7, %v1003_v48, %v1005_v49 }
 0x170   : > { %2262 = vmatmul.mubr.msk.bf16.vlgmr.msra.gmra.mrb[0].mxu1 %vm412_vm5, %v2117_v16  ;;  %2340 = vmatmul.mubr.msk.bf16.vlgmr.msra.gmra.mrb[0].mxu0 %vm412_vm5, %v2145_v17  ;;  %v1011_v55 = vsel %vm416_vm3, %v1006_v51, 0  ;;  %v2163_v16 = vld [vmem:[%s3727_s25] ss:$0 sm:$0xff]  ;;  %s2731_s25 = scalar_lea.vmem %s1909_s7, 64 }
 0x171   : > { %2344 = vmatpush3.bf16.msra.mxu0 %v1498_v18  ;;  %2266 = vmatpush3.bf16.msra.mxu1 %v793_v19  ;;  %p2732_p9 = scmp.ne.s32.totalorder %s1909_s7, %s2731_s25  ;;  %p2739_p11 = scmp.lt.s32.totalorder %s2737_s2, %s2731_s25 }
 0x172   : > { %2267 = vmatprep.mubr.msk.bf16.mxu1 %vm2891_vm0, %v2890_v0  ;;  %2345 = vmatprep.mubr.msk.bf16.mxu0 %vm2891_vm0, %v2890_v0  ;;  %v1760_v56 = vpop.permute.xlu0 %1759  ;;  %v1762_v57 = vpop.permute.xlu1 %1761 }
 0x173   : > { %2349 = vmatprep.subr.bf16.mxu0 %v2890_v0  ;;  %2271 = vmatprep.subr.bf16.mxu1 %v2890_v0  ;;  %v1763_v60 = vsel %vm787_vm8, %v1760_v56, %v1762_v57  ;;  %p2733_p1 = pnand %p2732_p9, %p3730_p12  ;;  %p2740_p7 = por %p2739_p11, %p2738_p4 }
 0x174   : > { %v1768_v2 = vsel %vm416_vm3, %v1763_v60, 0 }
 0x175   : > { %p2734_p2 = pneg %p2733_p1 }
 0x176   : > { %v1057_v58 = vpop.permute.xlu0 %1056  ;;  %v1059_v59 = vpop.permute.xlu1 %1058 }
 0x177   : > { %v1060_v61 = vsel %vm567_vm9, %v1057_v58, %v1059_v59  ;;  %p2741_p3 = pnand %p2740_p7, %p2734_p2 }
 0x178   : > { %v1065_v3 = vsel %vm416_vm3, %v1060_v61, 0 }
 0x17a   : > { %v1814_v4 = vpop.permute.xlu0 %1813  ;;  %v1816_v5 = vpop.permute.xlu1 %1815 }
 0x17b   : > { %v1817_v6 = vsel %vm842_vm10, %v1814_v4, %v1816_v5 }
 0x17c   : > { %2268 = vmatmul.mubr.msk.bf16.vlgmr.msra.gmra.mrb[0].mxu1 %vm412_vm5, %v2119_v26  ;;  %2346 = vmatmul.mubr.msk.bf16.vlgmr.msra.gmra.mrb[0].mxu0 %vm412_vm5, %v2149_v27  ;;  %v1822_v9 = vsel %vm416_vm3, %v1817_v6, 0 }
 0x17d   : > { %2350 = vmatpush3.bf16.msra.mxu0 %v1552_v28  ;;  %2272 = vmatpush3.bf16.msra.mxu1 %v848_v29 }
 0x17e   : > { %2273 = vmatprep.mubr.msk.bf16.mxu1 %vm2891_vm0, %v2890_v0  ;;  %2351 = vmatprep.mubr.msk.bf16.mxu0 %vm2891_vm0, %v2890_v0 }
 0x17f   : > { %2355 = vmatprep.subr.bf16.mxu0 %v2890_v0  ;;  %2277 = vmatprep.subr.bf16.mxu1 %v2890_v0 }
 0x188   : > { %2274 = vmatmul.mubr.msk.bf16.vlgmr.msra.gmra.mrb[0].mxu1 %vm412_vm5, %v2121_v33  ;;  %2352 = vmatmul.mubr.msk.bf16.vlgmr.msra.gmra.mrb[0].mxu0 %vm412_vm5, %v2151_v34 }
 0x189   : > { %2356 = vmatpush3.bf16.msra.mxu0 %v1606_v35  ;;  %2278 = vmatpush3.bf16.msra.mxu1 %v898_v36 }
 0x18a   : > { %2279 = vmatprep.mubr.msk.bf16.mxu1 %vm2891_vm0, %v2890_v0  ;;  %2357 = vmatprep.mubr.msk.bf16.mxu0 %vm2891_vm0, %v2890_v0 }
 0x18b   : > { %2361 = vmatprep.subr.bf16.mxu0 %v2890_v0  ;;  %2283 = vmatprep.subr.bf16.mxu1 %v2890_v0 }
 0x194   : > { %2280 = vmatmul.mubr.msk.bf16.vlgmr.msra.gmra.mrb[0].mxu1 %vm412_vm5, %v2123_v42  ;;  %2358 = vmatmul.mubr.msk.bf16.vlgmr.msra.gmra.mrb[0].mxu0 %vm412_vm5, %v2153_v43 }
 0x195   : > { %2362 = vmatpush3.bf16.msra.mxu0 %v1660_v44  ;;  %2284 = vmatpush3.bf16.msra.mxu1 %v957_v45 }
 0x196   : > { %2285 = vmatprep.mubr.msk.bf16.mxu1 %vm2891_vm0, %v2890_v0  ;;  %2363 = vmatprep.mubr.msk.bf16.mxu0 %vm2891_vm0, %v2890_v0 }
 0x197   : > { %2367 = vmatprep.subr.bf16.mxu0 %v2890_v0  ;;  %2289 = vmatprep.subr.bf16.mxu1 %v2890_v0 }
 0x1a0   : > { %2286 = vmatmul.mubr.msk.bf16.vlgmr.msra.gmra.mrb[0].mxu1 %vm412_vm5, %v2125_v52  ;;  %2364 = vmatmul.mubr.msk.bf16.vlgmr.msra.gmra.mrb[0].mxu0 %vm412_vm5, %v2155_v53 }
 0x1a1   : > { %2368 = vmatpush3.bf16.msra.mxu0 %v1714_v54  ;;  %2290 = vmatpush3.bf16.msra.mxu1 %v1011_v55 }
 0x1a2   : > { %2291 = vmatprep.mubr.msk.bf16.mxu1 %vm2891_vm0, %v2890_v0  ;;  %2369 = vmatprep.mubr.msk.bf16.mxu0 %vm2891_vm0, %v2890_v0 }
 0x1a3   : > { %2373 = vmatprep.subr.bf16.mxu0 %v2890_v0  ;;  %2295 = vmatprep.subr.bf16.mxu1 %v2890_v0 }
 0x1ac   : > { %2292 = vmatmul.mubr.msk.bf16.vlgmr.msra.gmra.mrb[0].mxu1 %vm412_vm5, %v2129_v62  ;;  %2370 = vmatmul.mubr.msk.bf16.vlgmr.msra.gmra.mrb[0].mxu0 %vm412_vm5, %v2157_v63 }
 0x1ad   : > { %2374 = vmatpush3.bf16.msra.mxu0 %v1768_v2  ;;  %2296 = vmatpush3.bf16.msra.mxu1 %v1065_v3 }
 0x1ae   : > { %2297 = vmatprep.mubr.msk.bf16.mxu1 %vm2891_vm0, %v2890_v0  ;;  %2375 = vmatprep.mubr.msk.bf16.mxu0 %vm2891_vm0, %v2890_v0 }
 0x1af   : > { %2379 = vmatprep.subr.bf16.mxu0 %v2890_v0 }
 0x1b8   : > { %2298 = vmatmul.mubr.msk.bf16.vlgmr.msra.gmra.mrb[0].mxu1 %vm412_vm5, %v2131_v7  ;;  %2376 = vmatmul.mubr.msk.bf16.vlgmr.msra.gmra.mrb[0].mxu0 %vm412_vm5, %v2159_v8 }
 0x1b9   : > { %2380 = vmatpush3.bf16.msra.mxu0 %v1822_v9  ;;  %2381 = vmatprep.mubr.msk.bf16.mxu0 %vm2891_vm0, %v2890_v0 }
 0x1c4   : > { %2382 = vmatmul.mubr.msk.bf16.vlgmr.msra.gmra.mrb[0].mxu0 %vm412_vm5, %v2161_v10 }
 0x28b   : > { %v1101_v11 = vpop.f32.mrb[0].mxu1 }
 0x28c   : > { %v2299_v12 = vpop.f32.mrb[1].mxu1 }
 0x28d   : > { %v1104_v13 = vpop.f32.mrb[2].mxu1 }
 0x28e   : > { %v2300_v14 = vpop.f32.mrb[3].mxu1 }
 0x297   : > { %v1858_v15 = vpop.f32.mrb[0].mxu0 }
 0x298   : > { %v2385_v17 = vadd.f32 %v1858_v15, %v1101_v11  ;;  %v2383_v0 = vpop.f32.mrb[1].mxu0 }
 0x299   : > { %v1861_v18 = vpop.f32.mrb[2].mxu0 }
 0x29a   : > { %v1865_v19 = vpack.c.bf16 %v2385_v17, %v2385_v17  ;;  %v2384_v20 = vpop.f32.mrb[3].mxu0  ;;  %v1874_v21 = vmul.f32 %v2385_v17, %v2163_v16 }
 0x29c   : > { %1875 = vadd.xlane.f32.xlu0 %v1874_v21  ;;  %v1877_v22 = vmul.f32 %v1874_v21, %v1874_v21  ;;  %1866 = vst [vmem:[%s375_s6] sm:$0xf] %v1865_v19 }
 0x29e   : > { %1878 = vadd.xlane.f32.xlu1 %v1877_v22 }
 0x29f   : > { %2744 = shalt.err (!%p2741_p3)
}
 0x2a0   : > { %s2745_s14 = scalar_lea.hbm %s3577_s4, 64  ;;  %s2749_s0 = scalar_lea.hbm %s3729_s11, 1024 }
 0x2a1   : > { %p2746_p5 = scmp.ne.s32.totalorder %s3577_s4, %s2745_s14  ;;  %p2750_p6 = scmp.lt.u32.totalorder %s3577_s4, %s3729_s11 }
 0x2a2   : > { %p2751_p13 = scmp.lt.u32.totalorder %s2749_s0, %s2745_s14  ;;  %p2753_p9 = scmp.lt.u32.totalorder %s2745_s14, %s3577_s4 }
 0x2a3   : > { %p2747_p10 = pnand %p2746_p5, %p3730_p12 }
 0x2a4   : > { %p2752_p0 = por %p2751_p13, %p2750_p6 }
 0x2a5   : > { %p2748_p8 = pneg %p2747_p10 }
 0x2a6   : > { %p2754_p1 = por %p2753_p9, %p2752_p0 }
 0x2a8   : > { %p2755_p2 = pnand %p2754_p1, %p2748_p8 }
 0x2aa   : > { %2758 = shalt.err (!%p2755_p2)
}
 0x2ab   : > { %2493 = dma.vmem_to_hbm [thread:$0]  (%p3730_p12), %s1909_s7, 64, %s3577_s4, %s1885_s21   ;;  %vm1880_vm11 = vcmask 7168   ;;  %vm1882_vm12 = vcmask 15360  }
 0x2ac   : > { %p388_p4 = scmp.lt.s32.totalorder %s3725_s19, 1  ;;  %p390_p11 = scmp.lt.s32.totalorder %s3726_s1, 7 }
 0x2ad   : > { %s3731_s16 = sld [smem:[#allocation27_spill]] }
 0x2ae   : > { %s3757_s19 = smov (!%p388_p4, %s3725_s19), 1  ;;  %s3759_s1 = smov (!%p390_p11, %s3726_s1), 7 }
 0x2af   : > { %s2102_s2 = sshll.u32 %s3757_s19, 3 }
 0x2b0   : > { %s393_s9 = sadd.s32 %s2102_s2, %s3759_s1 }
 0x2b1   : > { %s2103_s15 = sshll.u32 %s393_s9, 3 }
 0x2b3   : > { %s395_s14 = scalar_lea.vmem %s3731_s16, %s2103_s15 }
 0x329   : > { %v1876_v23 = vpop.xlane.xlu0 %1875 }
 0x32b   : > { %v1879_v24 = vpop.xlane.xlu1 %1878 }
 0x32c   : > { %v1881_v25 = vsel %vm1880_vm11, %v1876_v23, %v1879_v24 }
 0x32d   : > { %1883 = vst.msk [vmem:[%s395_s14] sm:$0xff] %vm1882_vm12, %v1881_v25 }
 0x32e PF: > { %p2510_p12 = scmp.ge.s32.totalorder %s2885_s10, 2  ;;  %s1923_s17 = sand.u32 1, %s2857_s27  }
 0x32f   : > { %p3732_p7 = scmp.ne.s32.totalorder %s3708_s12, 0  ;;  %s1924_s19 = scalar_lea.sflag [#allocation4], %s1923_s17 }
 0x331   : > { %p2506_p3 = pnand %p2510_p12, %p3732_p7 }
 0x333   : > { %2828 = dma.done.wait (!%p2506_p3), %s1924_s19, 64  }
 0x334   : > { %2830 = vsyncadd (!%p2506_p3), %s1924_s19, 4294967232  ;;  %s26_s10 = sadd.s32 1, %s2885_s10   ;;  %s3734_s4 = sld [smem:[#allocation13_spill]] }
 0x335   : > { %p3609_p5 = scmp.ge.s32.totalorder %s26_s10, 18   ;;  %s3735_s7 = sld [smem:[#allocation20_spill]] }
 0x336   : > { %s3736_s6 = smov %s3119_s24  ;;  %s3737_s12 = sld [smem:[#allocation16_spill]] }
 0x337   : > { %s3738_s3 = sld [smem:[#allocation17_spill]]  ;;  %s3739_s9 = sld [smem:[#allocation18_spill]] }
 0x338   : > { %s3740_s21 = smov %s2837_s22  ;;  %s3741_s22 = smov %s2841_s23 }
 0x339   : > { %s3742_s23 = smov %s3186_s13  ;;  %s3744_s25 = smov %s2853_s26 }
 0x33a   : > { %s3743_s24 = smov %s3734_s4  ;;  %s3746_s27 = smov %s2861_s28 }
 0x33b   : > { %s3745_s26 = smov %s3735_s7  ;;  %s3747_s28 = smov %s2865_s29 }
 0x33c   : > { %s3748_s29 = smov %s3736_s6  ;;  %s3749_s30 = smov %s2877_s8 }
 0x33d   : > { %s3750_s7 = smov %s3737_s12  ;;  %s3751_s8 = smov %s3738_s3 }
 0x33e   :  { %25 = sbr.rel (!%p3609_p5) target bundleno = 20 (0x14), region = 147 }
 0x345   :  { %1940 = vsyncpa [#allocation3], 1 }
 0x346   :  { %1942 = vsyncpa [#allocation3 + $0x1], 1 }
 0x347   :  { %1943 = vsyncpa [#allocation6], 1 }
 0x348   :  { %1945 = vsyncpa [#allocation6 + $0x1], 1 }
 0x349   :  { %1946 = vsyncpa [#allocation4], 1 }
 0x34a   :  { %1948 = vsyncpa [#allocation4 + $0x1], 1 }

</bundles_post_ra>
